<compile_context>
chip_gen: v7x
topology: tpu7x:2x2x1
jax: 0.10.0
libtpu: 0.0.40
codegen_flags: <defaults>
</compile_context>

<pallas_src>
import jax
import jax.numpy as jnp
from jax.experimental import pallas as pl
from jax.experimental.pallas import tpu as pltpu


def _round_up(x, m):
    return ((x + m - 1) // m) * m


def _make_disc_kernel(seg_dims, din, din_pad):
    """Fused 3-layer MLP kernel; the input concat is assembled in VMEM."""
    n_seg = len(seg_dims)
    offsets = []
    off = 0
    for d in seg_dims:
        offsets.append(off)
        off += d

    def kernel(*refs):
        seg_refs = refs[:n_seg]
        (w1_ref, b1_ref, w2_ref, b2_ref, w3_ref, b3_ref,
         o_ref, x_buf) = refs[n_seg:]

        # Assemble concat([ob, ob_next, ac]) in a bf16 scratch so layer 1 is a
        # single MXU pass (one vmatmul stream instead of 3 skinny K<=16 dots).
        if din_pad > din:
            x_buf[:, din:] = jnp.zeros((x_buf.shape[0], din_pad - din),
                                       x_buf.dtype)
        for o, d, s_ref in zip(offsets, seg_dims, seg_refs):
            x_buf[:, o:o + d] = s_ref[...]

        # Layer 1: (tb, D_in_pad) @ (D_in_pad, 256), f32 accumulation.
        z1 = jnp.dot(x_buf[...], w1_ref[...],
                     preferred_element_type=jnp.float32)
        h1 = jnp.tanh(z1 + b1_ref[...])                    # f32 VPU/EUP math

        # Layer 2: Linear(256 -> 256) + tanh.
        h2 = jnp.tanh(
            jnp.dot(h1.astype(jnp.bfloat16), w2_ref[...],
                    preferred_element_type=jnp.float32) + b2_ref[...])

        # Output layer (256 -> 1): VPU multiply + XLU lane reduction; b3 is a
        # scalar read from SMEM.
        o_ref[...] = (jnp.sum(h2 * w3_ref[...], axis=-1, keepdims=True)
                      + b3_ref[0]).astype(o_ref.dtype)

    return kernel


def discriminator_forward(params, ob, ob_next=None, ac=None, *, block_b=1024):
    """Run the fused discriminator MLP. Inputs stay un-concatenated."""
    segs = [s for s in (ob, ob_next, ac) if s is not None]
    # bf16 activations straight into the kernel (half the DMA bytes, already
    # in MXU-consumable packing).
    segs = [s.astype(jnp.bfloat16) for s in segs]
    seg_dims = [int(s.shape[-1]) for s in segs]

    B = int(segs[0].shape[0])
    # Single grid step for small/medium batches: per-step fixed overhead
    # dominates this tiny MLP and v5e/v6e have one TensorCore anyway.
    if B <= block_b:
        tb = _round_up(max(B, 8), 8)
    else:
        tb = block_b
    Bp = _round_up(B, tb)
    if Bp != B:
        segs = [jnp.pad(s, ((0, Bp - B), (0, 0))) for s in segs]
    nb = Bp // tb

    din = sum(seg_dims)
    din_pad = _round_up(din, 16)          # bf16 sublane packing for W1 rows

    w1 = params["w1"].astype(jnp.bfloat16)
    assert int(w1.shape[0]) == din
    if din_pad != din:
        w1 = jnp.pad(w1, ((0, din_pad - din), (0, 0)))   # zero rows
    b1 = params["b1"].astype(jnp.float32)
    w2 = params["w2"].astype(jnp.bfloat16)
    b2 = params["b2"].astype(jnp.float32)
    w3 = params["w3"].astype(jnp.float32)                 # (1, 256) row, VPU
    b3 = params["b3"].astype(jnp.float32).reshape(1)      # SMEM scalar

    H1 = int(w1.shape[1])
    H2 = int(w2.shape[1])

    seg_specs = [pl.BlockSpec((tb, d), lambda i: (i, 0)) for d in seg_dims]
    full = lambda shape: pl.BlockSpec(shape, lambda i: (0,) * len(shape))

    flops = 2 * Bp * (din_pad * H1 + H1 * H2 + H2)
    bytes_accessed = (2 * (w1.size + w2.size)                 # bf16 weights
                      + 4 * (b1.size + b2.size + w3.size + 1)  # f32 params
                      + 2 * Bp * din                           # bf16 inputs
                      + 4 * Bp)                                # f32 output

    out = pl.pallas_call(
        _make_disc_kernel(seg_dims, din, din_pad),
        out_shape=jax.ShapeDtypeStruct((Bp, 1), jnp.float32),
        grid=(nb,),
        in_specs=seg_specs + [
            full((din_pad, H1)),   # w1 (zero-padded rows)
            full((1, H1)),         # b1
            full((H1, H2)),        # w2
            full((1, H2)),         # b2
            full((1, H2)),         # w3 (torch Linear(256,1).weight row)
            pl.BlockSpec(memory_space=pltpu.MemorySpace.SMEM),  # b3 scalar
        ],
        out_specs=pl.BlockSpec((tb, 1), lambda i: (i, 0)),
        scratch_shapes=[pltpu.VMEM((tb, din_pad), jnp.bfloat16)],
        compiler_params=pltpu.CompilerParams(
            dimension_semantics=("parallel",)),
        cost_estimate=pl.CostEstimate(
            flops=flops,
            transcendentals=Bp * (H1 + H2),
            bytes_accessed=bytes_accessed),
    )(*segs, w1, b1, w2, b2, w3, b3)

    if Bp != B:
        out = out[:B]
    return out


def init_params(key, seg_dims, mlp_dim=(256, 256), out_dim=1):
    """Synthetic f32 weights matching the torch MLP shapes.

    torch.nn.Linear(in, out).weight is (out, in); W1/W2 are stored transposed
    as (in, out) since they feed `x @ W`; W3 keeps its natural (1, 256) row
    (it feeds a VPU reduction). All parameters are f32; the wrapper casts the
    MXU operands to bf16.
    """
    input_dim = sum(seg_dims)
    dims = [input_dim, *mlp_dim, out_dim]
    keys = jax.random.split(key, 2 * (len(dims) - 1))
    params = {}
    for i, (din, dout) in enumerate(zip(dims[:-1], dims[1:]), start=1):
        bound = 1.0 / (din ** 0.5)
        w = jax.random.uniform(keys[2 * (i - 1)], (din, dout), jnp.float32,
                               -bound, bound)
        b = jax.random.uniform(keys[2 * (i - 1) + 1], (1, dout), jnp.float32,
                               -bound, bound)
        if i < len(dims) - 1:
            params[f"w{i}"] = w                 # (in, out)
        else:
            params[f"w{i}"] = w.T               # (1, 256) row
        params[f"b{i}"] = b
    return params


def _reference_forward(params, segs):
    x = jnp.concatenate(segs, axis=-1).astype(jnp.float32)
    h = jnp.tanh(x @ params["w1"] + params["b1"])
    h = jnp.tanh(h @ params["w2"] + params["b2"])
    return jnp.sum(h * params["w3"], axis=-1, keepdims=True) + params["b3"]


if __name__ == "__main__":
    key = jax.random.PRNGKey(0)
    k_ob, k_obn, k_ac, k_p = jax.random.split(key, 4)

    # Batched rows (many envs / timesteps per call); small but MXU-exercising.
    B = 256
    OB_DIM, OB_NEXT_DIM, AC_DIM = 16, 16, 8

    ob = jax.random.normal(k_ob, (B, OB_DIM), jnp.float32)
    ob_next = jax.random.normal(k_obn, (B, OB_NEXT_DIM), jnp.float32)
    ac = jax.random.normal(k_ac, (B, AC_DIM), jnp.float32)

    params = init_params(k_p, (OB_DIM, OB_NEXT_DIM, AC_DIM))

    out = discriminator_forward(params, ob, ob_next, ac)
    out = jax.block_until_ready(out)
    assert out.shape == (B, 1), out.shape

    ref = _reference_forward(params, [ob, ob_next, ac])
    max_err = float(jnp.max(jnp.abs(out - ref)))
    # bf16 MXU operands/activations with f32 accumulation -> ~1e-2 error.
    assert jnp.allclose(out, ref, atol=3e-2, rtol=3e-2), max_err

    print("KERNEL_OK")
</pallas_src>

<mosaic_0001>
module attributes {stable_mosaic.version = 11 : i64} {
  func.func @kernel(%arg0: i32, %arg1: memref<256x16xbf16, #tpu.memory_space<vmem>>, %arg2: memref<256x16xbf16, #tpu.memory_space<vmem>>, %arg3: memref<256x8xbf16, #tpu.memory_space<vmem>>, %arg4: memref<48x256xbf16, #tpu.memory_space<vmem>>, %arg5: memref<1x256xf32, #tpu.memory_space<vmem>>, %arg6: memref<256x256xbf16, #tpu.memory_space<vmem>>, %arg7: memref<1x256xf32, #tpu.memory_space<vmem>>, %arg8: memref<1x256xf32, #tpu.memory_space<vmem>>, %arg9: memref<1xf32, #tpu.memory_space<smem>>, %arg10: memref<256x1xf32, #tpu.memory_space<vmem>>, %arg11: memref<256x48xbf16, #tpu.memory_space<vmem>>) attributes {dimension_semantics = [#tpu.dimension_semantics<parallel>], iteration_bounds = array<i64: 1>, scalar_prefetch = 0 : i64, scratch_operands = 1 : i64, tpu.core_type = #tpu.core_type<tc>, window_params = [{transform_indices = @transform_0, window_bounds = array<i64: 256, 16>}, {transform_indices = @transform_1, window_bounds = array<i64: 256, 16>}, {transform_indices = @transform_2, window_bounds = array<i64: 256, 8>}, {pipeline_mode = #tpu.pipeline_mode<synchronous>, transform_indices = @transform_3, window_bounds = array<i64: 48, 256>}, {pipeline_mode = #tpu.pipeline_mode<synchronous>, transform_indices = @transform_4, window_bounds = array<i64: 1, 256>}, {pipeline_mode = #tpu.pipeline_mode<synchronous>, transform_indices = @transform_5, window_bounds = array<i64: 256, 256>}, {pipeline_mode = #tpu.pipeline_mode<synchronous>, transform_indices = @transform_6, window_bounds = array<i64: 1, 256>}, {pipeline_mode = #tpu.pipeline_mode<synchronous>, transform_indices = @transform_7, window_bounds = array<i64: 1, 256>}, {transform_indices = @transform_8, window_bounds = array<i64: 1>}, {transform_indices = @transform_9, window_bounds = array<i64: 256, 1>}]} {
    %cst = arith.constant 0.000000e+00 : bf16
    %0 = vector.broadcast %cst : bf16 to vector<256x8xbf16>
    %c0 = arith.constant 0 : index
    %c40 = arith.constant 40 : index
    %1 = vector.load %arg11[%c0, %c40] : memref<256x48xbf16, #tpu.memory_space<vmem>>, vector<256x8xbf16>
    tpu.vector_store %arg11[%c0, %c40], %0 {strides = array<i32>} : memref<256x48xbf16, #tpu.memory_space<vmem>>, vector<256x8xbf16>,
    %c0_0 = arith.constant 0 : index
    %c0_1 = arith.constant 0 : index
    %2 = vector.load %arg1[%c0_0, %c0_1] : memref<256x16xbf16, #tpu.memory_space<vmem>>, vector<256x16xbf16>
    %c0_2 = arith.constant 0 : index
    %c0_3 = arith.constant 0 : index
    %3 = vector.load %arg11[%c0_2, %c0_3] : memref<256x48xbf16, #tpu.memory_space<vmem>>, vector<256x16xbf16>
    tpu.vector_store %arg11[%c0_2, %c0_3], %2 {strides = array<i32>} : memref<256x48xbf16, #tpu.memory_space<vmem>>, vector<256x16xbf16>,
    %c0_4 = arith.constant 0 : index
    %c0_5 = arith.constant 0 : index
    %4 = vector.load %arg2[%c0_4, %c0_5] : memref<256x16xbf16, #tpu.memory_space<vmem>>, vector<256x16xbf16>
    %c0_6 = arith.constant 0 : index
    %c16 = arith.constant 16 : index
    %5 = vector.load %arg11[%c0_6, %c16] : memref<256x48xbf16, #tpu.memory_space<vmem>>, vector<256x16xbf16>
    tpu.vector_store %arg11[%c0_6, %c16], %4 {strides = array<i32>} : memref<256x48xbf16, #tpu.memory_space<vmem>>, vector<256x16xbf16>,
    %c0_7 = arith.constant 0 : index
    %c0_8 = arith.constant 0 : index
    %6 = vector.load %arg3[%c0_7, %c0_8] : memref<256x8xbf16, #tpu.memory_space<vmem>>, vector<256x8xbf16>
    %c0_9 = arith.constant 0 : index
    %c32 = arith.constant 32 : index
    %7 = vector.load %arg11[%c0_9, %c32] : memref<256x48xbf16, #tpu.memory_space<vmem>>, vector<256x8xbf16>
    tpu.vector_store %arg11[%c0_9, %c32], %6 {strides = array<i32>} : memref<256x48xbf16, #tpu.memory_space<vmem>>, vector<256x8xbf16>,
    %c0_10 = arith.constant 0 : index
    %c0_11 = arith.constant 0 : index
    %8 = vector.load %arg11[%c0_10, %c0_11] : memref<256x48xbf16, #tpu.memory_space<vmem>>, vector<256x48xbf16>
    %c0_12 = arith.constant 0 : index
    %c0_13 = arith.constant 0 : index
    %9 = vector.load %arg4[%c0_12, %c0_13] : memref<48x256xbf16, #tpu.memory_space<vmem>>, vector<48x256xbf16>
    %cst_14 = arith.constant dense<0.000000e+00> : vector<256x256xf32>
    %10 = tpu.matmul %8, %9, %cst_14 {dimension_numbers = #tpu.dot_dimension_numbers<[1], [0], [0], [1], [0, 0, 1, 1], [], []>} : vector<256x48xbf16>, vector<48x256xbf16>, vector<256x256xf32> -> vector<256x256xf32>
    %c0_15 = arith.constant 0 : index
    %c0_16 = arith.constant 0 : index
    %11 = vector.load %arg5[%c0_15, %c0_16] : memref<1x256xf32, #tpu.memory_space<vmem>>, vector<1x256xf32>
    %12 = vector.broadcast %11 : vector<1x256xf32> to vector<256x256xf32>
    %13 = arith.addf %10, %12 : vector<256x256xf32>
    %14 = math.tanh %13 : vector<256x256xf32>
    %15 = arith.truncf %14 : vector<256x256xf32> to vector<256x256xbf16>
    %c0_17 = arith.constant 0 : index
    %c0_18 = arith.constant 0 : index
    %16 = vector.load %arg6[%c0_17, %c0_18] : memref<256x256xbf16, #tpu.memory_space<vmem>>, vector<256x256xbf16>
    %cst_19 = arith.constant dense<0.000000e+00> : vector<256x256xf32>
    %17 = tpu.matmul %15, %16, %cst_19 {dimension_numbers = #tpu.dot_dimension_numbers<[1], [0], [0], [1], [0, 0, 1, 1], [], []>} : vector<256x256xbf16>, vector<256x256xbf16>, vector<256x256xf32> -> vector<256x256xf32>
    %c0_20 = arith.constant 0 : index
    %c0_21 = arith.constant 0 : index
    %18 = vector.load %arg7[%c0_20, %c0_21] : memref<1x256xf32, #tpu.memory_space<vmem>>, vector<1x256xf32>
    %19 = vector.broadcast %18 : vector<1x256xf32> to vector<256x256xf32>
    %20 = arith.addf %17, %19 : vector<256x256xf32>
    %21 = math.tanh %20 : vector<256x256xf32>
    %c0_22 = arith.constant 0 : index
    %c0_23 = arith.constant 0 : index
    %22 = vector.load %arg8[%c0_22, %c0_23] : memref<1x256xf32, #tpu.memory_space<vmem>>, vector<1x256xf32>
    %23 = vector.broadcast %22 : vector<1x256xf32> to vector<256x256xf32>
    %24 = arith.mulf %21, %23 : vector<256x256xf32>
    %cst_24 = arith.constant dense<0.000000e+00> : vector<256xf32>
    %25 = vector.multi_reduction <add>, %24, %cst_24 [1] : vector<256x256xf32> to vector<256xf32>
    %26 = vector.shape_cast %25 : vector<256xf32> to vector<256x1xf32>
    %c0_25 = arith.constant 0 : index
    %27 = memref.load %arg9[%c0_25] : memref<1xf32, #tpu.memory_space<smem>>
    %28 = vector.broadcast %27 : f32 to vector<256x1xf32>
    %29 = arith.addf %26, %28 : vector<256x1xf32>
    %c0_26 = arith.constant 0 : index
    %c0_27 = arith.constant 0 : index
    %30 = vector.load %arg10[%c0_26, %c0_27] : memref<256x1xf32, #tpu.memory_space<vmem>>, vector<256x1xf32>
    tpu.vector_store %arg10[%c0_26, %c0_27], %29 {strides = array<i32>} : memref<256x1xf32, #tpu.memory_space<vmem>>, vector<256x1xf32>,
    return
  }
  func.func @transform_0(%arg0: i32) -> (i32, i32) {
    %c0_i32 = arith.constant 0 : i32
    %c0_i32_0 = arith.constant 0 : i32
    return %arg0, %c0_i32 : i32, i32
  }
  func.func @transform_1(%arg0: i32) -> (i32, i32) {
    %c0_i32 = arith.constant 0 : i32
    %c0_i32_0 = arith.constant 0 : i32
    return %arg0, %c0_i32 : i32, i32
  }
  func.func @transform_2(%arg0: i32) -> (i32, i32) {
    %c0_i32 = arith.constant 0 : i32
    %c0_i32_0 = arith.constant 0 : i32
    return %arg0, %c0_i32 : i32, i32
  }
  func.func @transform_3(%arg0: i32) -> (i32, i32) {
    %c0_i32 = arith.constant 0 : i32
    %c0_i32_0 = arith.constant 0 : i32
    %c0_i32_1 = arith.constant 0 : i32
    return %c0_i32, %c0_i32_0 : i32, i32
  }
  func.func @transform_4(%arg0: i32) -> (i32, i32) {
    %c0_i32 = arith.constant 0 : i32
    %c0_i32_0 = arith.constant 0 : i32
    %c0_i32_1 = arith.constant 0 : i32
    return %c0_i32, %c0_i32_0 : i32, i32
  }
  func.func @transform_5(%arg0: i32) -> (i32, i32) {
    %c0_i32 = arith.constant 0 : i32
    %c0_i32_0 = arith.constant 0 : i32
    %c0_i32_1 = arith.constant 0 : i32
    return %c0_i32, %c0_i32_0 : i32, i32
  }
  func.func @transform_6(%arg0: i32) -> (i32, i32) {
    %c0_i32 = arith.constant 0 : i32
    %c0_i32_0 = arith.constant 0 : i32
    %c0_i32_1 = arith.constant 0 : i32
    return %c0_i32, %c0_i32_0 : i32, i32
  }
  func.func @transform_7(%arg0: i32) -> (i32, i32) {
    %c0_i32 = arith.constant 0 : i32
    %c0_i32_0 = arith.constant 0 : i32
    %c0_i32_1 = arith.constant 0 : i32
    return %c0_i32, %c0_i32_0 : i32, i32
  }
  func.func @transform_8(%arg0: i32) -> i32 {
    %c0_i32 = arith.constant 0 : i32
    %c0_i32_0 = arith.constant 0 : i32
    return %c0_i32 : i32
  }
  func.func @transform_9(%arg0: i32) -> (i32, i32) {
    %c0_i32 = arith.constant 0 : i32
    %c0_i32_0 = arith.constant 0 : i32
    return %arg0, %c0_i32 : i32, i32
  }
}

</mosaic_0001>

<bundles_post_ra>
// kernel: tpu_custom_call.1
= control target key start
LH: loop header
LB: loop body
LE: loop exit
PB: predicated region body
PF: predicated region fallthrough
CT: control target
= control target key end

     0   :  { %vm34_vm0 = vcmask 392512   ;;  %v2154_v1 = vmov 0   ;;  %s2155_s13 = smov 16   ;;  %s2156_s18 = smov 32   ;;  %vm179_vm1 = vcmask 130048   ;;  %vm356_vm2 = vcmask 261248   ;;  %s2997_s1 = inlined_call_operand.vmem [shape: bf16[256,16], index: 1, kind: input, shape index: {}]   ;;  %s2998_s2 = inlined_call_operand.vmem [shape: bf16[256,8], index: 2, kind: input, shape index: {}]   ;;  %s2999_s0 = inlined_call_operand.vmem [shape: bf16[256,16], index: 0, kind: input, shape index: {}]   ;;  %s3000_s3 = inlined_call_operand.vmem [shape: bf16[48,256], index: 3, kind: input, shape index: {}]   ;;  %s3001_s5 = inlined_call_operand.vmem [shape: bf16[256,256], index: 5, kind: input, shape index: {}]   ;;  %s3002_s4 = inlined_call_operand.vmem [shape: f32[1,256], index: 4, kind: input, shape index: {}]   ;;  %s3003_s6 = inlined_call_operand.vmem [shape: f32[1,256], index: 6, kind: input, shape index: {}]   ;;  %s3004_s7 = inlined_call_operand.vmem [shape: f32[1,256], index: 7, kind: input, shape index: {}]   ;;  %s3005_s8 = inlined_call_operand.<no memory space> [shape: f32[1], index: 8, kind: input, shape index: {}]   ;;  %s3006_s9 = inlined_call_operand.vmem [shape: f32[256,1], index: 9, kind: output, shape index: {}]  }
   0x1   :  { %v1793_v0 = vld [vmem:[%s2997_s1] sm:$0xff]   ;;  %35 = vst.msk [vmem:[#allocation2] sm:$0xff] %vm34_vm0, %v2154_v1  ;;  %36 = vst.msk [vmem:[#allocation2 + $0x8] sm:$0xff] %vm34_vm0, %v2154_v1  ;;  %695 = vmatprep.mubr.bf16.mxu0 %v2154_v1  ;;  %v1795_v3 = vld [vmem:[%s2997_s1 + $0x8] sm:$0xff]   ;;  %vm533_vm3 = vcmask 326912   ;;  %vm614_vm4 = vcmask 392192  }
   0x2   :  { %37 = vst.msk [vmem:[#allocation2 + $0x10] sm:$0xff] %vm34_vm0, %v2154_v1  ;;  %38 = vst.msk [vmem:[#allocation2 + $0x18] sm:$0xff] %vm34_vm0, %v2154_v1  ;;  %v1794_v2 = vld [vmem:[%s2998_s2] sm:$0xff]   ;;  %308 = vrot.lane.b32.xlu0 %v1793_v0, %s2155_s13  ;;  %310 = vrot.lane.b32.xlu1 %v1795_v3, %s2155_s13  ;;  %v1796_v4 = vld [vmem:[%s2998_s2 + $0x8] sm:$0xff]   ;;  %vm1619_vm5 = vcmask 7168  }
   0x3   :  { %39 = vst.msk [vmem:[#allocation2 + $0x20] sm:$0xff] %vm34_vm0, %v2154_v1  ;;  %40 = vst.msk [vmem:[#allocation2 + $0x28] sm:$0xff] %vm34_vm0, %v2154_v1  ;;  %v1797_v5 = vld [vmem:[%s2997_s1 + $0x10] sm:$0xff]   ;;  %v1799_v7 = vld [vmem:[%s2997_s1 + $0x18] sm:$0xff]  }
   0x4   :  { %41 = vst.msk [vmem:[#allocation2 + $0x30] sm:$0xff] %vm34_vm0, %v2154_v1  ;;  %42 = vst.msk [vmem:[#allocation2 + $0x38] sm:$0xff] %vm34_vm0, %v2154_v1  ;;  %v1798_v6 = vld [vmem:[%s2998_s2 + $0x10] sm:$0xff]   ;;  %v1800_v8 = vld [vmem:[%s2998_s2 + $0x18] sm:$0xff]  }
   0x5   :  { %43 = vst.msk [vmem:[#allocation2 + $0x40] sm:$0xff] %vm34_vm0, %v2154_v1  ;;  %44 = vst.msk [vmem:[#allocation2 + $0x48] sm:$0xff] %vm34_vm0, %v2154_v1  ;;  %v1801_v9 = vld [vmem:[%s2997_s1 + $0x20] sm:$0xff]   ;;  %v1803_v11 = vld [vmem:[%s2997_s1 + $0x28] sm:$0xff]  }
   0x6   :  { %45 = vst.msk [vmem:[#allocation2 + $0x50] sm:$0xff] %vm34_vm0, %v2154_v1  ;;  %46 = vst.msk [vmem:[#allocation2 + $0x58] sm:$0xff] %vm34_vm0, %v2154_v1  ;;  %485 = vrot.lane.b32.xlu0 %v1794_v2, %s2156_s18  ;;  %487 = vrot.lane.b32.xlu1 %v1796_v4, %s2156_s18  ;;  %v1802_v10 = vld [vmem:[%s2998_s2 + $0x20] sm:$0xff]   ;;  %v1804_v12 = vld [vmem:[%s2998_s2 + $0x28] sm:$0xff]  }
   0x7   :  { %47 = vst.msk [vmem:[#allocation2 + $0x60] sm:$0xff] %vm34_vm0, %v2154_v1  ;;  %48 = vst.msk [vmem:[#allocation2 + $0x68] sm:$0xff] %vm34_vm0, %v2154_v1  ;;  %v1805_v13 = vld [vmem:[%s2997_s1 + $0x30] sm:$0xff]   ;;  %v1807_v15 = vld [vmem:[%s2997_s1 + $0x38] sm:$0xff]  }
   0x8   :  { %49 = vst.msk [vmem:[#allocation2 + $0x70] sm:$0xff] %vm34_vm0, %v2154_v1  ;;  %50 = vst.msk [vmem:[#allocation2 + $0x78] sm:$0xff] %vm34_vm0, %v2154_v1  ;;  %v1806_v14 = vld [vmem:[%s2998_s2 + $0x30] sm:$0xff]   ;;  %v1808_v16 = vld [vmem:[%s2998_s2 + $0x38] sm:$0xff]  }
   0x9   :  { %v1809_v17 = vld [vmem:[%s2997_s1 + $0x40] sm:$0xff]   ;;  %v1811_v22 = vld [vmem:[%s2997_s1 + $0x48] sm:$0xff]   ;;  %v1827_v23 = vld [vmem:[%s3000_s3 + $0x14] ss:$8 sps:$4 sm:$0xff]  }
   0xa   :  { %312 = vrot.lane.b32.xlu0 %v1797_v5, %s2155_s13  ;;  %489 = vrot.lane.b32.xlu1 %v1798_v6, %s2156_s18  ;;  %v1821_v18 = vld [vmem:[%s2999_s0] sm:$0xff]   ;;  %v1829_v24 = vld [vmem:[%s3000_s3 + $0x10] ss:$8 sps:$4 sm:$0xff]  }
   0xb   :  { %v1822_v19 = vld [vmem:[%s3000_s3 + $0x4] ss:$8 sps:$4 sm:$0xff]   ;;  %180 = vst.msk [vmem:[#allocation2] sm:$0xff] %vm179_vm1, %v1821_v18  ;;  %v1825_v21 = vld [vmem:[%s3000_s3] ss:$8 sps:$4 sm:$0xff]   ;;  %v1813_v28 = vld [vmem:[%s2997_s1 + $0x50] sm:$0xff]  }
   0xc   :  { %v1810_v20 = vld [vmem:[%s2998_s2 + $0x40] sm:$0xff]   ;;  %663 = vmatprep.subr.bf16.mxu0 %v1822_v19  ;;  %v1830_v25 = vld [vmem:[%s2999_s0 + $0x8] sm:$0xff]   ;;  %v1814_v30 = vld [vmem:[%s2998_s2 + $0x50] sm:$0xff]  }
   0xd   :  { %664 = vmatpush1.bf16.msra.mxu0 %v1825_v21  ;;  %v1831_v26 = vld [vmem:[%s3000_s3 + $0x24] ss:$8 sps:$4 sm:$0xff]   ;;  %181 = vst.msk [vmem:[#allocation2 + $0x8] sm:$0xff] %vm179_vm1, %v1830_v25  ;;  %v1834_v29 = vld [vmem:[%s3000_s3 + $0x20] ss:$8 sps:$4 sm:$0xff]   ;;  %v1836_v31 = vld [vmem:[%s2999_s0 + $0x10] sm:$0xff]  }
   0xe   :  { %314 = vrot.lane.b32.xlu0 %v1799_v7, %s2155_s13  ;;  %491 = vrot.lane.b32.xlu1 %v1800_v8, %s2156_s18  ;;  %v1812_v27 = vld [vmem:[%s2998_s2 + $0x48] sm:$0xff]   ;;  %v1837_v32 = vld [vmem:[%s2999_s0 + $0x18] sm:$0xff]   ;;  %182 = vst.msk [vmem:[#allocation2 + $0x10] sm:$0xff] %vm179_vm1, %v1836_v31 }
   0xf   :  { %665 = vmatprep.subr.bf16.mxu0 %v1827_v23  ;;  %v1815_v33 = vld [vmem:[%s2997_s1 + $0x58] sm:$0xff]   ;;  %v1838_v34 = vld [vmem:[%s2999_s0 + $0x20] sm:$0xff]   ;;  %183 = vst.msk [vmem:[#allocation2 + $0x18] sm:$0xff] %vm179_vm1, %v1837_v32  ;;  %v1839_v35 = vld [vmem:[%s2999_s0 + $0x28] sm:$0xff]  }
  0x10   :  { %v1816_v36 = vld [vmem:[%s2998_s2 + $0x58] sm:$0xff]   ;;  %184 = vst.msk [vmem:[#allocation2 + $0x20] sm:$0xff] %vm179_vm1, %v1838_v34  ;;  %v1840_v37 = vld [vmem:[%s2999_s0 + $0x30] sm:$0xff]   ;;  %185 = vst.msk [vmem:[#allocation2 + $0x28] sm:$0xff] %vm179_vm1, %v1839_v35 }
  0x11   :  { %666 = vmatpush1.bf16.msra.mxu0 %v1829_v24  ;;  %v1841_v38 = vld [vmem:[%s2999_s0 + $0x38] sm:$0xff]   ;;  %v1817_v39 = vld [vmem:[%s2997_s1 + $0x60] sm:$0xff]   ;;  %186 = vst.msk [vmem:[#allocation2 + $0x30] sm:$0xff] %vm179_vm1, %v1840_v37  ;;  %v1819_v42 = vld [vmem:[%s2997_s1 + $0x68] sm:$0xff]  }
  0x12   :  { %316 = vrot.lane.b32.xlu0 %v1801_v9, %s2155_s13  ;;  %493 = vrot.lane.b32.xlu1 %v1802_v10, %s2156_s18  ;;  %187 = vst.msk [vmem:[#allocation2 + $0x38] sm:$0xff] %vm179_vm1, %v1841_v38  ;;  %v1818_v40 = vld [vmem:[%s2998_s2 + $0x60] sm:$0xff]   ;;  %v1820_v43 = vld [vmem:[%s2998_s2 + $0x68] sm:$0xff]  }
  0x13   :  { %667 = vmatprep.subr.bf16.mxu0 %v1831_v26  ;;  %v1842_v41 = vld [vmem:[%s2999_s0 + $0x40] sm:$0xff]   ;;  %v1824_v44 = vld [vmem:[%s2997_s1 + $0x70] sm:$0xff]   ;;  %v1843_v46 = vld [vmem:[%s2999_s0 + $0x48] sm:$0xff]  }
  0x14   :  { %188 = vst.msk [vmem:[#allocation2 + $0x40] sm:$0xff] %vm179_vm1, %v1842_v41  ;;  %v1826_v45 = vld [vmem:[%s2998_s2 + $0x70] sm:$0xff]   ;;  %v1833_v47 = vld [vmem:[%s2997_s1 + $0x78] sm:$0xff]   ;;  %189 = vst.msk [vmem:[#allocation2 + $0x48] sm:$0xff] %vm179_vm1, %v1843_v46 }
  0x15   :  { %668 = vmatpush1.bf16.msra.mxu0 %v1834_v29  ;;  %v1835_v48 = vld [vmem:[%s2998_s2 + $0x78] sm:$0xff]   ;;  %v1844_v49 = vld [vmem:[%s2999_s0 + $0x50] sm:$0xff]   ;;  %v1846_v51 = vld [vmem:[%s2999_s0 + $0x60] sm:$0xff]  }
  0x16   :  { %318 = vrot.lane.b32.xlu0 %v1803_v11, %s2155_s13  ;;  %495 = vrot.lane.b32.xlu1 %v1804_v12, %s2156_s18  ;;  %190 = vst.msk [vmem:[#allocation2 + $0x50] sm:$0xff] %vm179_vm1, %v1844_v49  ;;  %v1845_v50 = vld [vmem:[%s2999_s0 + $0x58] sm:$0xff]   ;;  %192 = vst.msk [vmem:[#allocation2 + $0x60] sm:$0xff] %vm179_vm1, %v1846_v51  ;;  %v1847_v52 = vld [vmem:[%s2999_s0 + $0x68] sm:$0xff]  }
  0x17   :  { %191 = vst.msk [vmem:[#allocation2 + $0x58] sm:$0xff] %vm179_vm1, %v1845_v50  ;;  %193 = vst.msk [vmem:[#allocation2 + $0x68] sm:$0xff] %vm179_vm1, %v1847_v52  ;;  %v1848_v53 = vld [vmem:[%s2999_s0 + $0x70] sm:$0xff]   ;;  %v1849_v54 = vld [vmem:[%s2999_s0 + $0x78] sm:$0xff]  }
  0x18   :  { %194 = vst.msk [vmem:[#allocation2 + $0x70] sm:$0xff] %vm179_vm1, %v1848_v53  ;;  %195 = vst.msk [vmem:[#allocation2 + $0x78] sm:$0xff] %vm179_vm1, %v1849_v54  ;;  %v1852_v59 = vld [vmem:[%s3001_s5 + $0x4] ss:$8 sps:$4 sm:$0xff]   ;;  %v1850_v61 = vld [vmem:[%s3001_s5] ss:$8 sps:$4 sm:$0xff]  }
  0x19   :  { %1156 = vmatprep.subr.bf16.mxu0 %v1852_v59  ;;  %v1855_v62 = vld [vmem:[%s3001_s5 + $0x14] ss:$8 sps:$4 sm:$0xff]   ;;  %1758 = vmatprep.subr.bf16.mxu1 %v1852_v59  ;;  %v1853_v3 = vld [vmem:[%s3001_s5 + $0x10] ss:$8 sps:$4 sm:$0xff]   ;;  %v1858_v5 = vld [vmem:[%s3001_s5 + $0x24] ss:$8 sps:$4 sm:$0xff]  }
  0x1a   :  { %320 = vrot.lane.b32.xlu0 %v1805_v13, %s2155_s13  ;;  %497 = vrot.lane.b32.xlu1 %v1806_v14, %s2156_s18  ;;  %v1856_v7 = vld [vmem:[%s3001_s5 + $0x20] ss:$8 sps:$4 sm:$0xff]   ;;  %v1861_v10 = vld [vmem:[%s3001_s5 + $0x34] ss:$8 sps:$4 sm:$0xff]  }
  0x1b   :  { %1774 = vmatpush1.bf16.msra.mxu1 %v1850_v61  ;;  %v1859_v12 = vld [vmem:[%s3001_s5 + $0x30] ss:$8 sps:$4 sm:$0xff]   ;;  %v1864_v14 = vld [vmem:[%s3001_s5 + $0x44] ss:$8 sps:$4 sm:$0xff]   ;;  %v1867_v19 = vld [vmem:[%s3001_s5 + $0x54] ss:$8 sps:$4 sm:$0xff]  }
  0x1c   :  { %1759 = vmatprep.subr.bf16.mxu1 %v1855_v62  ;;  %v1865_v21 = vld [vmem:[%s3001_s5 + $0x50] ss:$8 sps:$4 sm:$0xff]   ;;  %v1870_v23 = vld [vmem:[%s3001_s5 + $0x64] ss:$8 sps:$4 sm:$0xff]   ;;  %v1868_v25 = vld [vmem:[%s3001_s5 + $0x60] ss:$8 sps:$4 sm:$0xff]  }
  0x1d   :  { %v1876_v32 = vld [vmem:[%s3001_s5 + $0x84] ss:$8 sps:$4 sm:$0xff]   ;;  %v1874_v34 = vld [vmem:[%s3001_s5 + $0x80] ss:$8 sps:$4 sm:$0xff]   ;;  %v1879_v37 = vld [vmem:[%s3001_s5 + $0x94] ss:$8 sps:$4 sm:$0xff]  }
  0x1e   :  { %322 = vrot.lane.b32.xlu0 %v1807_v15, %s2155_s13  ;;  %499 = vrot.lane.b32.xlu1 %v1808_v16, %s2156_s18  ;;  %v1862_v16 = vld [vmem:[%s3001_s5 + $0x40] ss:$8 sps:$4 sm:$0xff]   ;;  %v1882_v41 = vld [vmem:[%s3001_s5 + $0xa4] ss:$8 sps:$4 sm:$0xff]  }
  0x1f   :  { %1775 = vmatpush1.bf16.msra.mxu1 %v1853_v3 }
  0x20   :  { %1760 = vmatprep.subr.bf16.mxu1 %v1858_v5 }
  0x22   :  { %324 = vrot.lane.b32.xlu0 %v1809_v17, %s2155_s13  ;;  %501 = vrot.lane.b32.xlu1 %v1810_v20, %s2156_s18 }
  0x23   :  { %1776 = vmatpush1.bf16.msra.mxu1 %v1856_v7 }
  0x24   :  { %1761 = vmatprep.subr.bf16.mxu1 %v1861_v10 }
  0x26   :  { %326 = vrot.lane.b32.xlu0 %v1811_v22, %s2155_s13  ;;  %503 = vrot.lane.b32.xlu1 %v1812_v27, %s2156_s18 }
  0x27   :  { %1777 = vmatpush1.bf16.msra.mxu1 %v1859_v12 }
  0x28   :  { %1762 = vmatprep.subr.bf16.mxu1 %v1864_v14 }
  0x2a   :  { %328 = vrot.lane.b32.xlu0 %v1813_v28, %s2155_s13  ;;  %505 = vrot.lane.b32.xlu1 %v1814_v30, %s2156_s18  ;;  %v1873_v28 = vld [vmem:[%s3001_s5 + $0x74] ss:$8 sps:$4 sm:$0xff]   ;;  %v1871_v30 = vld [vmem:[%s3001_s5 + $0x70] ss:$8 sps:$4 sm:$0xff]  }
  0x2b   :  { %1778 = vmatpush1.bf16.msra.mxu1 %v1862_v16 }
  0x2c   :  { %1763 = vmatprep.subr.bf16.mxu1 %v1867_v19 }
  0x2e   :  { %330 = vrot.lane.b32.xlu0 %v1815_v33, %s2155_s13  ;;  %507 = vrot.lane.b32.xlu1 %v1816_v36, %s2156_s18 }
  0x2f   :  { %1779 = vmatpush1.bf16.msra.mxu1 %v1865_v21 }
  0x30   :  { %1764 = vmatprep.subr.bf16.mxu1 %v1870_v23 }
  0x32   :  { %332 = vrot.lane.b32.xlu0 %v1817_v39, %s2155_s13  ;;  %509 = vrot.lane.b32.xlu1 %v1818_v40, %s2156_s18  ;;  %v1877_v39 = vld [vmem:[%s3001_s5 + $0x90] ss:$8 sps:$4 sm:$0xff]  }
  0x33   :  { %1780 = vmatpush1.bf16.msra.mxu1 %v1868_v25 }
  0x34   :  { %1765 = vmatprep.subr.bf16.mxu1 %v1873_v28 }
  0x36   :  { %334 = vrot.lane.b32.xlu0 %v1819_v42, %s2155_s13  ;;  %511 = vrot.lane.b32.xlu1 %v1820_v43, %s2156_s18  ;;  %v1880_v43 = vld [vmem:[%s3001_s5 + $0xa0] ss:$8 sps:$4 sm:$0xff]  }
  0x37   :  { %1781 = vmatpush1.bf16.msra.mxu1 %v1871_v30 }
  0x38   :  { %1766 = vmatprep.subr.bf16.mxu1 %v1876_v32 }
  0x3a   :  { %336 = vrot.lane.b32.xlu0 %v1824_v44, %s2155_s13  ;;  %513 = vrot.lane.b32.xlu1 %v1826_v45, %s2156_s18 }
  0x3b   :  { %1782 = vmatpush1.bf16.msra.mxu1 %v1874_v34 }
  0x3c   :  { %1767 = vmatprep.subr.bf16.mxu1 %v1879_v37 }
  0x3e   :  { %338 = vrot.lane.b32.xlu0 %v1833_v47, %s2155_s13  ;;  %515 = vrot.lane.b32.xlu1 %v1835_v48, %s2156_s18 }
  0x3f   :  { %1783 = vmatpush1.bf16.msra.mxu1 %v1877_v39 }
  0x40   :  { %1768 = vmatprep.subr.bf16.mxu1 %v1882_v41 }
  0x43   :  { %1784 = vmatpush1.bf16.msra.mxu1 %v1880_v43 }
  0x74   :  { %v309_v55 = vpop.permute.xlu0 %308  ;;  %v311_v56 = vpop.permute.xlu1 %310 }
  0x75   :  { %357 = vst.msk [vmem:[#allocation2] sm:$0xff] %vm356_vm2, %v309_v55  ;;  %358 = vst.msk [vmem:[#allocation2 + $0x8] sm:$0xff] %vm356_vm2, %v311_v56 }
  0x78   :  { %v486_v57 = vpop.permute.xlu0 %485  ;;  %v488_v58 = vpop.permute.xlu1 %487 }
  0x79   :  { %534 = vst.msk [vmem:[#allocation2] sm:$0xff] %vm533_vm3, %v486_v57  ;;  %535 = vst.msk [vmem:[#allocation2 + $0x8] sm:$0xff] %vm533_vm3, %v488_v58  ;;  %v1885_v57 = vld [vmem:[%s3001_s5 + $0xb4] ss:$8 sps:$4 sm:$0xff]   ;;  %v1883_v58 = vld [vmem:[%s3001_s5 + $0xb0] ss:$8 sps:$4 sm:$0xff]  }
  0x7a   :  { %1769 = vmatprep.subr.bf16.mxu1 %v1885_v57 }
  0x7b   :  { %1785 = vmatpush1.bf16.msra.mxu1 %v1883_v58 }
  0x7c   :  { %v313_v60 = vpop.permute.xlu0 %312  ;;  %v490_v63 = vpop.permute.xlu1 %489 }
  0x7d   :  { %359 = vst.msk [vmem:[#allocation2 + $0x10] sm:$0xff] %vm356_vm2, %v313_v60  ;;  %v1888_v60 = vld [vmem:[%s3001_s5 + $0xc4] ss:$8 sps:$4 sm:$0xff]  }
  0x7e   :  { %536 = vst.msk [vmem:[#allocation2 + $0x10] sm:$0xff] %vm533_vm3, %v490_v63  ;;  %1770 = vmatprep.subr.bf16.mxu1 %v1888_v60  ;;  %v1889_v63 = vld [vmem:[%s3001_s5 + $0xd0] ss:$8 sps:$4 sm:$0xff]  }
  0x80   :  { %v550_v0 = vld [vmem:[#allocation2] sm:$0xff]  ;;  %v315_v2 = vpop.permute.xlu0 %314  ;;  %v492_v4 = vpop.permute.xlu1 %491  ;;  %v551_v8 = vld [vmem:[#allocation2 + $0x8] sm:$0xff] }
  0x81   :  { %1710 = vmatmul.mubr.msk.bf16.vlgmr.msra.gmra.mrb[0].mxu0 %vm614_vm4, %v550_v0  ;;  %360 = vst.msk [vmem:[#allocation2 + $0x18] sm:$0xff] %vm356_vm2, %v315_v2  ;;  %v1894_v2 = vld [vmem:[%s3001_s5 + $0xe4] ss:$8 sps:$4 sm:$0xff]  }
  0x82   :  { %705 = vmatprep.mubr.bf16.mxu0 %v2154_v1  ;;  %1157 = vmatpush1.bf16.msra.mxu0 %v1850_v61  ;;  %537 = vst.msk [vmem:[#allocation2 + $0x18] sm:$0xff] %vm533_vm3, %v492_v4  ;;  %v1886_v61 = vld [vmem:[%s3001_s5 + $0xc0] ss:$8 sps:$4 sm:$0xff]   ;;  %v1897_v4 = vld [vmem:[%s3001_s5 + $0xf4] ss:$8 sps:$4 sm:$0xff]  }
  0x83   :  { %1158 = vmatprep.subr.bf16.mxu0 %v1855_v62  ;;  %1786 = vmatpush1.bf16.msra.mxu1 %v1886_v61  ;;  %v1891_v62 = vld [vmem:[%s3001_s5 + $0xd4] ss:$8 sps:$4 sm:$0xff]  }
  0x84   :  { %v317_v6 = vpop.permute.xlu0 %316  ;;  %v494_v9 = vpop.permute.xlu1 %493  ;;  %1771 = vmatprep.subr.bf16.mxu1 %v1891_v62 }
  0x85   :  { %361 = vst.msk [vmem:[#allocation2 + $0x20] sm:$0xff] %vm356_vm2, %v317_v6  ;;  %v552_v17 = vld [vmem:[#allocation2 + $0x10] sm:$0xff] }
  0x86   :  { %1159 = vmatpush1.bf16.msra.mxu0 %v1853_v3  ;;  %538 = vst.msk [vmem:[#allocation2 + $0x20] sm:$0xff] %vm533_vm3, %v494_v9  ;;  %v1892_v3 = vld [vmem:[%s3001_s5 + $0xe0] ss:$8 sps:$4 sm:$0xff]   ;;  %v574_v9 = vlaneseq }
  0x87   :  { %1160 = vmatprep.subr.bf16.mxu0 %v1858_v5  ;;  %1787 = vmatpush1.bf16.msra.mxu1 %v1889_v63  ;;  %v1895_v5 = vld [vmem:[%s3001_s5 + $0xf0] ss:$8 sps:$4 sm:$0xff]  }
  0x88   :  { %v319_v11 = vpop.permute.xlu0 %318  ;;  %v496_v13 = vpop.permute.xlu1 %495  ;;  %1772 = vmatprep.subr.bf16.mxu1 %v1894_v2 }
  0x89   :  { %1711 = vmatmul.mubr.msk.bf16.gmra.mrb[4].mxu0 %vm614_vm4, %v551_v8  ;;  %362 = vst.msk [vmem:[#allocation2 + $0x28] sm:$0xff] %vm356_vm2, %v319_v11  ;;  %v553_v26 = vld [vmem:[#allocation2 + $0x18] sm:$0xff] }
  0x8a   :  { %715 = vmatprep.mubr.bf16.mxu0 %v2154_v1  ;;  %1161 = vmatpush1.bf16.msra.mxu0 %v1856_v7  ;;  %539 = vst.msk [vmem:[#allocation2 + $0x28] sm:$0xff] %vm533_vm3, %v496_v13 }
  0x8b   :  { %1162 = vmatprep.subr.bf16.mxu0 %v1861_v10  ;;  %1788 = vmatpush1.bf16.msra.mxu1 %v1892_v3  ;;  %v575_v10 = vshrl.u32 %v574_v9, 7 }
  0x8c   :  { %v321_v15 = vpop.permute.xlu0 %320  ;;  %v498_v18 = vpop.permute.xlu1 %497  ;;  %1773 = vmatprep.subr.bf16.mxu1 %v1897_v4 }
  0x8d   :  { %363 = vst.msk [vmem:[#allocation2 + $0x30] sm:$0xff] %vm356_vm2, %v321_v15  ;;  %v554_v35 = vld [vmem:[#allocation2 + $0x20] sm:$0xff]  ;;  %v2609_v11 = vsub.s32 0, %v575_v10  ;;  %v2614_v13 = vsub.s32 1, %v575_v10 }
  0x8e   :  { %1163 = vmatpush1.bf16.msra.mxu0 %v1859_v12  ;;  %540 = vst.msk [vmem:[#allocation2 + $0x30] sm:$0xff] %vm533_vm3, %v498_v18  ;;  %v572_v12 = vld [vmem:[%s3002_s4] sm:$0x3] }
  0x8f   :  { %1164 = vmatprep.subr.bf16.mxu0 %v1864_v14  ;;  %1789 = vmatpush1.bf16.msra.mxu1 %v1895_v5  ;;  %v2617_v14 = vrot.slane %v572_v12, %v2609_v11  ;;  %v2620_v15 = vrot.slane %v572_v12, %v2614_v13 }
  0x90   :  { %v323_v20 = vpop.permute.xlu0 %322  ;;  %v500_v22 = vpop.permute.xlu1 %499 }
  0x91   :  { %1712 = vmatmul.mubr.msk.bf16.gmra.mrb[8].mxu0 %vm614_vm4, %v552_v17  ;;  %364 = vst.msk [vmem:[#allocation2 + $0x38] sm:$0xff] %vm356_vm2, %v323_v20  ;;  %v555_v44 = vld [vmem:[#allocation2 + $0x28] sm:$0xff] }
  0x92   :  { %725 = vmatprep.mubr.bf16.mxu0 %v2154_v1  ;;  %1165 = vmatpush1.bf16.msra.mxu0 %v1862_v16  ;;  %541 = vst.msk [vmem:[#allocation2 + $0x38] sm:$0xff] %vm533_vm3, %v500_v22 }
  0x93   :  { %1166 = vmatprep.subr.bf16.mxu0 %v1867_v19 }
  0x94   :  { %v325_v24 = vpop.permute.xlu0 %324  ;;  %v502_v27 = vpop.permute.xlu1 %501 }
  0x95   :  { %365 = vst.msk [vmem:[#allocation2 + $0x40] sm:$0xff] %vm356_vm2, %v325_v24  ;;  %v556_v49 = vld [vmem:[#allocation2 + $0x30] sm:$0xff] }
  0x96   :  { %1167 = vmatpush1.bf16.msra.mxu0 %v1865_v21  ;;  %542 = vst.msk [vmem:[#allocation2 + $0x40] sm:$0xff] %vm533_vm3, %v502_v27 }
  0x97   :  { %1168 = vmatprep.subr.bf16.mxu0 %v1870_v23 }
  0x98   :  { %v327_v29 = vpop.permute.xlu0 %326  ;;  %v504_v31 = vpop.permute.xlu1 %503 }
  0x99   :  { %1713 = vmatmul.mubr.msk.bf16.gmra.mrb[12].mxu0 %vm614_vm4, %v553_v26  ;;  %366 = vst.msk [vmem:[#allocation2 + $0x48] sm:$0xff] %vm356_vm2, %v327_v29  ;;  %v557_v53 = vld [vmem:[#allocation2 + $0x38] sm:$0xff] }
  0x9a   :  { %735 = vmatprep.mubr.bf16.mxu0 %v2154_v1  ;;  %1169 = vmatpush1.bf16.msra.mxu0 %v1868_v25  ;;  %543 = vst.msk [vmem:[#allocation2 + $0x48] sm:$0xff] %vm533_vm3, %v504_v31 }
  0x9b   :  { %1170 = vmatprep.subr.bf16.mxu0 %v1873_v28 }
  0x9c   :  { %v329_v33 = vpop.permute.xlu0 %328  ;;  %v506_v36 = vpop.permute.xlu1 %505 }
  0x9d   :  { %367 = vst.msk [vmem:[#allocation2 + $0x50] sm:$0xff] %vm356_vm2, %v329_v33  ;;  %v558_v54 = vld [vmem:[#allocation2 + $0x40] sm:$0xff] }
  0x9e   :  { %1171 = vmatpush1.bf16.msra.mxu0 %v1871_v30  ;;  %544 = vst.msk [vmem:[#allocation2 + $0x50] sm:$0xff] %vm533_vm3, %v506_v36 }
  0x9f   :  { %1172 = vmatprep.subr.bf16.mxu0 %v1876_v32 }
  0xa0   :  { %v331_v38 = vpop.permute.xlu0 %330  ;;  %v508_v40 = vpop.permute.xlu1 %507 }
  0xa1   :  { %1714 = vmatmul.mubr.msk.bf16.gmra.mrb[16].mxu0 %vm614_vm4, %v554_v35  ;;  %368 = vst.msk [vmem:[#allocation2 + $0x58] sm:$0xff] %vm356_vm2, %v331_v38  ;;  %v559_v55 = vld [vmem:[#allocation2 + $0x48] sm:$0xff] }
  0xa2   :  { %745 = vmatprep.mubr.bf16.mxu0 %v2154_v1  ;;  %1173 = vmatpush1.bf16.msra.mxu0 %v1874_v34  ;;  %545 = vst.msk [vmem:[#allocation2 + $0x58] sm:$0xff] %vm533_vm3, %v508_v40 }
  0xa3   :  { %1174 = vmatprep.subr.bf16.mxu0 %v1879_v37 }
  0xa4   :  { %v333_v42 = vpop.permute.xlu0 %332  ;;  %v510_v45 = vpop.permute.xlu1 %509 }
  0xa5   :  { %369 = vst.msk [vmem:[#allocation2 + $0x60] sm:$0xff] %vm356_vm2, %v333_v42  ;;  %v560_v56 = vld [vmem:[#allocation2 + $0x50] sm:$0xff] }
  0xa6   :  { %1175 = vmatpush1.bf16.msra.mxu0 %v1877_v39  ;;  %546 = vst.msk [vmem:[#allocation2 + $0x60] sm:$0xff] %vm533_vm3, %v510_v45 }
  0xa7   :  { %1176 = vmatprep.subr.bf16.mxu0 %v1882_v41 }
  0xa8   :  { %v335_v46 = vpop.permute.xlu0 %334  ;;  %v512_v47 = vpop.permute.xlu1 %511 }
  0xa9   :  { %1715 = vmatmul.mubr.msk.bf16.gmra.mrb[20].mxu0 %vm614_vm4, %v555_v44  ;;  %370 = vst.msk [vmem:[#allocation2 + $0x68] sm:$0xff] %vm356_vm2, %v335_v46  ;;  %v561_v59 = vld [vmem:[#allocation2 + $0x58] sm:$0xff] }
  0xaa   :  { %755 = vmatprep.mubr.bf16.mxu0 %v2154_v1  ;;  %1177 = vmatpush1.bf16.msra.mxu0 %v1880_v43  ;;  %547 = vst.msk [vmem:[#allocation2 + $0x68] sm:$0xff] %vm533_vm3, %v512_v47 }
  0xab   :  { %1178 = vmatprep.subr.bf16.mxu0 %v1885_v57 }
  0xac   :  { %v337_v48 = vpop.permute.xlu0 %336  ;;  %v514_v50 = vpop.permute.xlu1 %513 }
  0xad   :  { %371 = vst.msk [vmem:[#allocation2 + $0x70] sm:$0xff] %vm356_vm2, %v337_v48  ;;  %v562_v0 = vld [vmem:[#allocation2 + $0x60] sm:$0xff] }
  0xae   :  { %548 = vst.msk [vmem:[#allocation2 + $0x70] sm:$0xff] %vm533_vm3, %v514_v50  ;;  %1179 = vmatpush1.bf16.msra.mxu0 %v1883_v58 }
  0xaf   :  { %1180 = vmatprep.subr.bf16.mxu0 %v1888_v60 }
  0xb0   :  { %v339_v51 = vpop.permute.xlu0 %338  ;;  %v516_v52 = vpop.permute.xlu1 %515 }
  0xb1   :  { %1716 = vmatmul.mubr.msk.bf16.gmra.mrb[24].mxu0 %vm614_vm4, %v556_v49  ;;  %372 = vst.msk [vmem:[#allocation2 + $0x78] sm:$0xff] %vm356_vm2, %v339_v51  ;;  %v563_v6 = vld [vmem:[#allocation2 + $0x68] sm:$0xff] }
  0xb2   :  { %765 = vmatprep.mubr.bf16.mxu0 %v2154_v1  ;;  %549 = vst.msk [vmem:[#allocation2 + $0x78] sm:$0xff] %vm533_vm3, %v516_v52  ;;  %1181 = vmatpush1.bf16.msra.mxu0 %v1886_v61 }
  0xb3   :  { %1182 = vmatprep.subr.bf16.mxu0 %v1891_v62 }
  0xb5   :  { %v564_v7 = vld [vmem:[#allocation2 + $0x70] sm:$0xff] }
  0xb6   :  { %1183 = vmatpush1.bf16.msra.mxu0 %v1889_v63 }
  0xb7   :  { %1184 = vmatprep.subr.bf16.mxu0 %v1894_v2 }
  0xb9   :  { %1717 = vmatmul.mubr.msk.bf16.gmra.mrb[28].mxu0 %vm614_vm4, %v557_v53  ;;  %v565_v8 = vld [vmem:[#allocation2 + $0x78] sm:$0xff] }
  0xba   :  { %775 = vmatprep.mubr.bf16.mxu0 %v2154_v1  ;;  %1185 = vmatpush1.bf16.msra.mxu0 %v1892_v3 }
  0xbb   :  { %1186 = vmatprep.subr.bf16.mxu0 %v1897_v4 }
  0xbe   :  { %1187 = vmatpush1.bf16.msra.mxu0 %v1895_v5 }
  0xc1   :  { %1718 = vmatmul.mubr.msk.bf16.gmra.mrb[32].mxu0 %vm614_vm4, %v558_v54 }
  0xc2   :  { %785 = vmatprep.mubr.bf16.mxu0 %v2154_v1 }
  0xc9   :  { %1719 = vmatmul.mubr.msk.bf16.gmra.mrb[36].mxu0 %vm614_vm4, %v559_v55 }
  0xca   :  { %795 = vmatprep.mubr.bf16.mxu0 %v2154_v1 }
  0xd1   :  { %1720 = vmatmul.mubr.msk.bf16.gmra.mrb[40].mxu0 %vm614_vm4, %v560_v56 }
  0xd2   :  { %805 = vmatprep.mubr.bf16.mxu0 %v2154_v1 }
  0xd9   :  { %1721 = vmatmul.mubr.msk.bf16.gmra.mrb[44].mxu0 %vm614_vm4, %v561_v59 }
  0xda   :  { %815 = vmatprep.mubr.bf16.mxu0 %v2154_v1 }
  0xe1   :  { %1722 = vmatmul.mubr.msk.bf16.gmra.mrb[48].mxu0 %vm614_vm4, %v562_v0 }
  0xe2   :  { %825 = vmatprep.mubr.bf16.mxu0 %v2154_v1 }
  0xe9   :  { %1723 = vmatmul.mubr.msk.bf16.gmra.mrb[52].mxu0 %vm614_vm4, %v563_v6 }
  0xea   :  { %835 = vmatprep.mubr.bf16.mxu0 %v2154_v1 }
  0xf1   :  { %1724 = vmatmul.mubr.msk.bf16.gmra.mrb[56].mxu0 %vm614_vm4, %v564_v7 }
  0xf2   :  { %845 = vmatprep.mubr.bf16.mxu0 %v2154_v1 }
  0xf9   :  { %1725 = vmatmul.mubr.msk.bf16.gmra.mrb[60].mxu0 %vm614_vm4, %v565_v8 }
 0x154   :  { %v697_v1 = vpop.f32.mrb[0].mxu0 }
 0x155   :  { %v698_v16 = vadd.f32 %v697_v1, %v2617_v14  ;;  %v699_v17 = vpop.f32.mrb[1].mxu0 }
 0x156   :  { %v700_v18 = vadd.f32 %v699_v17, %v2620_v15  ;;  %v701_v19 = vpop.f32.mrb[2].mxu0 }
 0x157   :  { %1898 = vtanh.f32 %v698_v16  ;;  %v702_v20 = vadd.f32 %v701_v19, %v2617_v14  ;;  %v703_v21 = vpop.f32.mrb[3].mxu0 }
 0x158   :  { %1900 = vtanh.f32 %v700_v18  ;;  %v704_v22 = vadd.f32 %v703_v21, %v2620_v15 }
 0x159   :  { %1902 = vtanh.f32 %v702_v20 }
 0x15a   :  { %1904 = vtanh.f32 %v704_v22 }
 0x15c   :  { %v707_v23 = vpop.f32.mrb[4].mxu0 }
 0x15d   :  { %v708_v24 = vadd.f32 %v707_v23, %v2617_v14  ;;  %v709_v25 = vpop.f32.mrb[5].mxu0 }
 0x15e   :  { %v710_v26 = vadd.f32 %v709_v25, %v2620_v15  ;;  %v711_v27 = vpop.f32.mrb[6].mxu0 }
 0x15f   :  { %1906 = vtanh.f32 %v708_v24  ;;  %v712_v28 = vadd.f32 %v711_v27, %v2617_v14  ;;  %v713_v29 = vpop.f32.mrb[7].mxu0 }
 0x160   :  { %1908 = vtanh.f32 %v710_v26  ;;  %v714_v30 = vadd.f32 %v713_v29, %v2620_v15 }
 0x161   :  { %v1899_v31 = vpop.eup %1898  ;;  %1910 = vtanh.f32 %v712_v28 }
 0x162   :  { %v1901_v32 = vpop.eup %1900  ;;  %1912 = vtanh.f32 %v714_v30 }
 0x163   :  { %v1903_v33 = vpop.eup %1902 }
 0x164   :  { %v1905_v34 = vpop.eup %1904  ;;  %v717_v35 = vpop.f32.mrb[8].mxu0  ;;  %v920_v36 = vpack.c.bf16 %v1903_v33, %v1899_v31 }
 0x165   :  { %v718_v37 = vadd.f32 %v717_v35, %v2617_v14  ;;  %v719_v38 = vpop.f32.mrb[9].mxu0  ;;  %v921_v39 = vpack.c.bf16 %v1905_v34, %v1901_v32 }
 0x166   :  { %v720_v40 = vadd.f32 %v719_v38, %v2620_v15  ;;  %v721_v41 = vpop.f32.mrb[10].mxu0 }
 0x167   :  { %1914 = vtanh.f32 %v718_v37  ;;  %v722_v42 = vadd.f32 %v721_v41, %v2617_v14  ;;  %v723_v43 = vpop.f32.mrb[11].mxu0  ;;  %1188 = vmatprep.mubr.bf16.mxu0 %v921_v39 }
 0x168   :  { %1916 = vtanh.f32 %v720_v40  ;;  %v724_v44 = vadd.f32 %v723_v43, %v2620_v15  ;;  %1189 = vmatmul.mubr.bf16.vlgmr.msra.gmra.mrb[64].mxu0 %v920_v36 }
 0x169   :  { %v1907_v45 = vpop.eup %1906  ;;  %1918 = vtanh.f32 %v722_v42 }
 0x16a   :  { %v1909_v46 = vpop.eup %1908  ;;  %1920 = vtanh.f32 %v724_v44 }
 0x16b   :  { %v1911_v47 = vpop.eup %1910 }
 0x16c   :  { %v1913_v48 = vpop.eup %1912  ;;  %v727_v49 = vpop.f32.mrb[12].mxu0  ;;  %v922_v50 = vpack.c.bf16 %v1911_v47, %v1907_v45 }
 0x16d   :  { %v728_v51 = vadd.f32 %v727_v49, %v2617_v14  ;;  %v729_v52 = vpop.f32.mrb[13].mxu0  ;;  %v923_v53 = vpack.c.bf16 %v1913_v48, %v1909_v46 }
 0x16e   :  { %v730_v54 = vadd.f32 %v729_v52, %v2620_v15  ;;  %v731_v55 = vpop.f32.mrb[14].mxu0 }
 0x16f   :  { %1922 = vtanh.f32 %v728_v51  ;;  %v732_v56 = vadd.f32 %v731_v55, %v2617_v14  ;;  %v733_v57 = vpop.f32.mrb[15].mxu0  ;;  %1198 = vmatprep.mubr.bf16.mxu0 %v923_v53 }
 0x170   :  { %1924 = vtanh.f32 %v730_v54  ;;  %v734_v58 = vadd.f32 %v733_v57, %v2620_v15  ;;  %1199 = vmatmul.mubr.bf16.gmra.mrb[68].mxu0 %v922_v50 }
 0x171   :  { %v1915_v59 = vpop.eup %1914  ;;  %1926 = vtanh.f32 %v732_v56 }
 0x172   :  { %v1917_v60 = vpop.eup %1916  ;;  %1928 = vtanh.f32 %v734_v58 }
 0x173   :  { %v1919_v61 = vpop.eup %1918 }
 0x174   :  { %v1921_v62 = vpop.eup %1920  ;;  %v737_v63 = vpop.f32.mrb[16].mxu0  ;;  %v924_v0 = vpack.c.bf16 %v1919_v61, %v1915_v59 }
 0x175   :  { %v738_v2 = vadd.f32 %v737_v63, %v2617_v14  ;;  %v739_v3 = vpop.f32.mrb[17].mxu0  ;;  %v925_v4 = vpack.c.bf16 %v1921_v62, %v1917_v60 }
 0x176   :  { %v740_v5 = vadd.f32 %v739_v3, %v2620_v15  ;;  %v741_v6 = vpop.f32.mrb[18].mxu0 }
 0x177   :  { %1930 = vtanh.f32 %v738_v2  ;;  %v742_v7 = vadd.f32 %v741_v6, %v2617_v14  ;;  %v743_v8 = vpop.f32.mrb[19].mxu0  ;;  %1208 = vmatprep.mubr.bf16.mxu0 %v925_v4 }
 0x178   :  { %1932 = vtanh.f32 %v740_v5  ;;  %v744_v9 = vadd.f32 %v743_v8, %v2620_v15  ;;  %1209 = vmatmul.mubr.bf16.gmra.mrb[72].mxu0 %v924_v0 }
 0x179   :  { %v1923_v10 = vpop.eup %1922  ;;  %1934 = vtanh.f32 %v742_v7 }
 0x17a   :  { %v1925_v12 = vpop.eup %1924  ;;  %1936 = vtanh.f32 %v744_v9 }
 0x17b   :  { %v1927_v1 = vpop.eup %1926 }
 0x17c   :  { %v1929_v16 = vpop.eup %1928  ;;  %v747_v17 = vpop.f32.mrb[20].mxu0  ;;  %v926_v18 = vpack.c.bf16 %v1927_v1, %v1923_v10 }
 0x17d   :  { %v748_v19 = vadd.f32 %v747_v17, %v2617_v14  ;;  %v749_v20 = vpop.f32.mrb[21].mxu0  ;;  %v927_v21 = vpack.c.bf16 %v1929_v16, %v1925_v12 }
 0x17e   :  { %v750_v22 = vadd.f32 %v749_v20, %v2620_v15  ;;  %v751_v23 = vpop.f32.mrb[22].mxu0 }
 0x17f   :  { %1938 = vtanh.f32 %v748_v19  ;;  %v752_v24 = vadd.f32 %v751_v23, %v2617_v14  ;;  %v753_v25 = vpop.f32.mrb[23].mxu0  ;;  %1218 = vmatprep.mubr.bf16.mxu1 %v927_v21 }
 0x180   :  { %1940 = vtanh.f32 %v750_v22  ;;  %v754_v26 = vadd.f32 %v753_v25, %v2620_v15  ;;  %1219 = vmatmul.mubr.bf16.vlgmr.msra.gmra.mrb[0].mxu1 %v926_v18 }
 0x181   :  { %v1931_v27 = vpop.eup %1930  ;;  %1942 = vtanh.f32 %v752_v24 }
 0x182   :  { %v1933_v28 = vpop.eup %1932  ;;  %1944 = vtanh.f32 %v754_v26 }
 0x183   :  { %v1935_v29 = vpop.eup %1934 }
 0x184   :  { %v1937_v30 = vpop.eup %1936  ;;  %v757_v31 = vpop.f32.mrb[24].mxu0  ;;  %v928_v32 = vpack.c.bf16 %v1935_v29, %v1931_v27 }
 0x185   :  { %v758_v33 = vadd.f32 %v757_v31, %v2617_v14  ;;  %v759_v34 = vpop.f32.mrb[25].mxu0  ;;  %v929_v35 = vpack.c.bf16 %v1937_v30, %v1933_v28 }
 0x186   :  { %v760_v36 = vadd.f32 %v759_v34, %v2620_v15  ;;  %v761_v37 = vpop.f32.mrb[26].mxu0 }
 0x187   :  { %1946 = vtanh.f32 %v758_v33  ;;  %v762_v38 = vadd.f32 %v761_v37, %v2617_v14  ;;  %v763_v39 = vpop.f32.mrb[27].mxu0  ;;  %1228 = vmatprep.mubr.bf16.mxu1 %v929_v35 }
 0x188   :  { %1948 = vtanh.f32 %v760_v36  ;;  %v764_v40 = vadd.f32 %v763_v39, %v2620_v15  ;;  %1229 = vmatmul.mubr.bf16.gmra.mrb[4].mxu1 %v928_v32 }
 0x189   :  { %v1939_v41 = vpop.eup %1938  ;;  %1950 = vtanh.f32 %v762_v38 }
 0x18a   :  { %v1941_v42 = vpop.eup %1940  ;;  %1952 = vtanh.f32 %v764_v40 }
 0x18b   :  { %v1943_v43 = vpop.eup %1942 }
 0x18c   :  { %v1945_v44 = vpop.eup %1944  ;;  %v767_v45 = vpop.f32.mrb[28].mxu0  ;;  %v930_v46 = vpack.c.bf16 %v1943_v43, %v1939_v41 }
 0x18d   :  { %v768_v47 = vadd.f32 %v767_v45, %v2617_v14  ;;  %v769_v48 = vpop.f32.mrb[29].mxu0  ;;  %v931_v49 = vpack.c.bf16 %v1945_v44, %v1941_v42 }
 0x18e   :  { %v770_v50 = vadd.f32 %v769_v48, %v2620_v15  ;;  %v771_v51 = vpop.f32.mrb[30].mxu0 }
 0x18f   :  { %1954 = vtanh.f32 %v768_v47  ;;  %v772_v52 = vadd.f32 %v771_v51, %v2617_v14  ;;  %v773_v53 = vpop.f32.mrb[31].mxu0  ;;  %1238 = vmatprep.mubr.bf16.mxu1 %v931_v49 }
 0x190   :  { %1956 = vtanh.f32 %v770_v50  ;;  %v774_v54 = vadd.f32 %v773_v53, %v2620_v15  ;;  %1239 = vmatmul.mubr.bf16.gmra.mrb[8].mxu1 %v930_v46 }
 0x191   :  { %v1947_v55 = vpop.eup %1946  ;;  %1958 = vtanh.f32 %v772_v52 }
 0x192   :  { %v1949_v56 = vpop.eup %1948  ;;  %1960 = vtanh.f32 %v774_v54 }
 0x193   :  { %v1951_v57 = vpop.eup %1950 }
 0x194   :  { %v1953_v58 = vpop.eup %1952  ;;  %v777_v59 = vpop.f32.mrb[32].mxu0  ;;  %v932_v60 = vpack.c.bf16 %v1951_v57, %v1947_v55 }
 0x195   :  { %v778_v61 = vadd.f32 %v777_v59, %v2617_v14  ;;  %v779_v62 = vpop.f32.mrb[33].mxu0  ;;  %v933_v63 = vpack.c.bf16 %v1953_v58, %v1949_v56 }
 0x196   :  { %v780_v0 = vadd.f32 %v779_v62, %v2620_v15  ;;  %v781_v2 = vpop.f32.mrb[34].mxu0 }
 0x197   :  { %1962 = vtanh.f32 %v778_v61  ;;  %v782_v3 = vadd.f32 %v781_v2, %v2617_v14  ;;  %v783_v4 = vpop.f32.mrb[35].mxu0  ;;  %1248 = vmatprep.mubr.bf16.mxu1 %v933_v63 }
 0x198   :  { %1964 = vtanh.f32 %v780_v0  ;;  %v784_v5 = vadd.f32 %v783_v4, %v2620_v15  ;;  %1249 = vmatmul.mubr.bf16.gmra.mrb[12].mxu1 %v932_v60 }
 0x199   :  { %v1955_v6 = vpop.eup %1954  ;;  %1966 = vtanh.f32 %v782_v3 }
 0x19a   :  { %v1957_v7 = vpop.eup %1956  ;;  %1968 = vtanh.f32 %v784_v5 }
 0x19b   :  { %v1959_v8 = vpop.eup %1958 }
 0x19c   :  { %v1961_v9 = vpop.eup %1960  ;;  %v787_v10 = vpop.f32.mrb[36].mxu0  ;;  %v934_v12 = vpack.c.bf16 %v1959_v8, %v1955_v6 }
 0x19d   :  { %v788_v1 = vadd.f32 %v787_v10, %v2617_v14  ;;  %v789_v16 = vpop.f32.mrb[37].mxu0  ;;  %v935_v17 = vpack.c.bf16 %v1961_v9, %v1957_v7 }
 0x19e   :  { %v790_v18 = vadd.f32 %v789_v16, %v2620_v15  ;;  %v791_v19 = vpop.f32.mrb[38].mxu0 }
 0x19f   :  { %1970 = vtanh.f32 %v788_v1  ;;  %v792_v20 = vadd.f32 %v791_v19, %v2617_v14  ;;  %v793_v21 = vpop.f32.mrb[39].mxu0  ;;  %1258 = vmatprep.mubr.bf16.mxu1 %v935_v17 }
 0x1a0   :  { %1972 = vtanh.f32 %v790_v18  ;;  %v794_v22 = vadd.f32 %v793_v21, %v2620_v15  ;;  %1259 = vmatmul.mubr.bf16.gmra.mrb[16].mxu1 %v934_v12 }
 0x1a1   :  { %v1963_v23 = vpop.eup %1962  ;;  %1974 = vtanh.f32 %v792_v20 }
 0x1a2   :  { %v1965_v24 = vpop.eup %1964  ;;  %1976 = vtanh.f32 %v794_v22 }
 0x1a3   :  { %v1967_v25 = vpop.eup %1966 }
 0x1a4   :  { %v1969_v26 = vpop.eup %1968  ;;  %v797_v27 = vpop.f32.mrb[40].mxu0  ;;  %v936_v28 = vpack.c.bf16 %v1967_v25, %v1963_v23 }
 0x1a5   :  { %v798_v29 = vadd.f32 %v797_v27, %v2617_v14  ;;  %v799_v30 = vpop.f32.mrb[41].mxu0  ;;  %v937_v31 = vpack.c.bf16 %v1969_v26, %v1965_v24 }
 0x1a6   :  { %v800_v32 = vadd.f32 %v799_v30, %v2620_v15  ;;  %v801_v33 = vpop.f32.mrb[42].mxu0 }
 0x1a7   :  { %1978 = vtanh.f32 %v798_v29  ;;  %v802_v34 = vadd.f32 %v801_v33, %v2617_v14  ;;  %v803_v35 = vpop.f32.mrb[43].mxu0  ;;  %1268 = vmatprep.mubr.bf16.mxu1 %v937_v31 }
 0x1a8   :  { %1980 = vtanh.f32 %v800_v32  ;;  %v804_v36 = vadd.f32 %v803_v35, %v2620_v15  ;;  %1269 = vmatmul.mubr.bf16.gmra.mrb[20].mxu1 %v936_v28 }
 0x1a9   :  { %v1971_v37 = vpop.eup %1970  ;;  %1982 = vtanh.f32 %v802_v34 }
 0x1aa   :  { %v1973_v38 = vpop.eup %1972  ;;  %1984 = vtanh.f32 %v804_v36 }
 0x1ab   :  { %v1975_v39 = vpop.eup %1974 }
 0x1ac   :  { %v1977_v40 = vpop.eup %1976  ;;  %v807_v41 = vpop.f32.mrb[44].mxu0  ;;  %v938_v42 = vpack.c.bf16 %v1975_v39, %v1971_v37 }
 0x1ad   :  { %v808_v43 = vadd.f32 %v807_v41, %v2617_v14  ;;  %v809_v44 = vpop.f32.mrb[45].mxu0  ;;  %v939_v45 = vpack.c.bf16 %v1977_v40, %v1973_v38 }
 0x1ae   :  { %v810_v46 = vadd.f32 %v809_v44, %v2620_v15  ;;  %v811_v47 = vpop.f32.mrb[46].mxu0 }
 0x1af   :  { %1986 = vtanh.f32 %v808_v43  ;;  %v812_v48 = vadd.f32 %v811_v47, %v2617_v14  ;;  %v813_v49 = vpop.f32.mrb[47].mxu0  ;;  %1278 = vmatprep.mubr.bf16.mxu1 %v939_v45 }
 0x1b0   :  { %1988 = vtanh.f32 %v810_v46  ;;  %v814_v50 = vadd.f32 %v813_v49, %v2620_v15  ;;  %1279 = vmatmul.mubr.bf16.gmra.mrb[24].mxu1 %v938_v42 }
 0x1b1   :  { %v1979_v51 = vpop.eup %1978  ;;  %1990 = vtanh.f32 %v812_v48 }
 0x1b2   :  { %v1981_v52 = vpop.eup %1980  ;;  %1992 = vtanh.f32 %v814_v50 }
 0x1b3   :  { %v1983_v53 = vpop.eup %1982 }
 0x1b4   :  { %v1985_v54 = vpop.eup %1984  ;;  %v817_v55 = vpop.f32.mrb[48].mxu0  ;;  %v940_v56 = vpack.c.bf16 %v1983_v53, %v1979_v51 }
 0x1b5   :  { %v818_v57 = vadd.f32 %v817_v55, %v2617_v14  ;;  %v819_v58 = vpop.f32.mrb[49].mxu0  ;;  %v941_v59 = vpack.c.bf16 %v1985_v54, %v1981_v52 }
 0x1b6   :  { %v820_v60 = vadd.f32 %v819_v58, %v2620_v15  ;;  %v821_v61 = vpop.f32.mrb[50].mxu0 }
 0x1b7   :  { %1994 = vtanh.f32 %v818_v57  ;;  %v822_v62 = vadd.f32 %v821_v61, %v2617_v14  ;;  %v823_v63 = vpop.f32.mrb[51].mxu0  ;;  %1288 = vmatprep.mubr.bf16.mxu1 %v941_v59 }
 0x1b8   :  { %1996 = vtanh.f32 %v820_v60  ;;  %v824_v0 = vadd.f32 %v823_v63, %v2620_v15  ;;  %1289 = vmatmul.mubr.bf16.gmra.mrb[28].mxu1 %v940_v56 }
 0x1b9   :  { %v1987_v2 = vpop.eup %1986  ;;  %1998 = vtanh.f32 %v822_v62 }
 0x1ba   :  { %v1989_v3 = vpop.eup %1988  ;;  %2000 = vtanh.f32 %v824_v0 }
 0x1bb   :  { %v1991_v4 = vpop.eup %1990 }
 0x1bc   :  { %v1993_v5 = vpop.eup %1992  ;;  %v827_v6 = vpop.f32.mrb[52].mxu0  ;;  %v942_v7 = vpack.c.bf16 %v1991_v4, %v1987_v2 }
 0x1bd   :  { %v828_v8 = vadd.f32 %v827_v6, %v2617_v14  ;;  %v829_v9 = vpop.f32.mrb[53].mxu0  ;;  %v943_v10 = vpack.c.bf16 %v1993_v5, %v1989_v3  ;;  %v1413_v5 = vld [vmem:[%s3004_s7] sm:$0x3] }
 0x1be   :  { %v830_v12 = vadd.f32 %v829_v9, %v2620_v15  ;;  %v831_v1 = vpop.f32.mrb[54].mxu0 }
 0x1bf   :  { %2002 = vtanh.f32 %v828_v8  ;;  %v832_v16 = vadd.f32 %v831_v1, %v2617_v14  ;;  %v833_v17 = vpop.f32.mrb[55].mxu0  ;;  %1298 = vmatprep.mubr.bf16.mxu1 %v943_v10 }
 0x1c0   :  { %2004 = vtanh.f32 %v830_v12  ;;  %v834_v18 = vadd.f32 %v833_v17, %v2620_v15  ;;  %1299 = vmatmul.mubr.bf16.gmra.mrb[32].mxu1 %v942_v7  ;;  %v2705_v12 = vrot.slane %v1413_v5, %v2609_v11  ;;  %v2709_v17 = vrot.slane %v1413_v5, %v2614_v13 }
 0x1c1   :  { %v1995_v19 = vpop.eup %1994  ;;  %2006 = vtanh.f32 %v832_v16 }
 0x1c2   :  { %v1997_v20 = vpop.eup %1996  ;;  %2008 = vtanh.f32 %v834_v18 }
 0x1c3   :  { %v1999_v21 = vpop.eup %1998 }
 0x1c4   :  { %v2001_v22 = vpop.eup %2000  ;;  %v837_v23 = vpop.f32.mrb[56].mxu0  ;;  %v944_v24 = vpack.c.bf16 %v1999_v21, %v1995_v19 }
 0x1c5   :  { %v838_v25 = vadd.f32 %v837_v23, %v2617_v14  ;;  %v839_v26 = vpop.f32.mrb[57].mxu0  ;;  %v945_v27 = vpack.c.bf16 %v2001_v22, %v1997_v20 }
 0x1c6   :  { %v840_v28 = vadd.f32 %v839_v26, %v2620_v15  ;;  %v841_v29 = vpop.f32.mrb[58].mxu0 }
 0x1c7   :  { %2010 = vtanh.f32 %v838_v25  ;;  %v842_v30 = vadd.f32 %v841_v29, %v2617_v14  ;;  %v843_v31 = vpop.f32.mrb[59].mxu0  ;;  %1308 = vmatprep.mubr.bf16.mxu1 %v945_v27 }
 0x1c8   :  { %2012 = vtanh.f32 %v840_v28  ;;  %v844_v32 = vadd.f32 %v843_v31, %v2620_v15  ;;  %1309 = vmatmul.mubr.bf16.gmra.mrb[36].mxu1 %v944_v24 }
 0x1c9   :  { %v2003_v33 = vpop.eup %2002  ;;  %2014 = vtanh.f32 %v842_v30 }
 0x1ca   :  { %v2005_v34 = vpop.eup %2004  ;;  %2016 = vtanh.f32 %v844_v32 }
 0x1cb   :  { %v2007_v35 = vpop.eup %2006 }
 0x1cc   :  { %v2009_v36 = vpop.eup %2008  ;;  %v847_v37 = vpop.f32.mrb[60].mxu0  ;;  %v946_v38 = vpack.c.bf16 %v2007_v35, %v2003_v33 }
 0x1cd   :  { %v848_v39 = vadd.f32 %v847_v37, %v2617_v14  ;;  %v849_v40 = vpop.f32.mrb[61].mxu0  ;;  %v947_v41 = vpack.c.bf16 %v2009_v36, %v2005_v34 }
 0x1ce   :  { %v850_v42 = vadd.f32 %v849_v40, %v2620_v15  ;;  %v851_v43 = vpop.f32.mrb[62].mxu0 }
 0x1cf   :  { %2018 = vtanh.f32 %v848_v39  ;;  %v852_v44 = vadd.f32 %v851_v43, %v2617_v14  ;;  %v853_v45 = vpop.f32.mrb[63].mxu0  ;;  %1318 = vmatprep.mubr.bf16.mxu1 %v947_v41 }
 0x1d0   :  { %2020 = vtanh.f32 %v850_v42  ;;  %v854_v46 = vadd.f32 %v853_v45, %v2620_v15  ;;  %1319 = vmatmul.mubr.bf16.gmra.mrb[40].mxu1 %v946_v38  ;;  %v984_v15 = vld [vmem:[%s3003_s6] sm:$0x3] }
 0x1d1   :  { %v2011_v47 = vpop.eup %2010  ;;  %2022 = vtanh.f32 %v852_v44  ;;  %v2690_v58 = vrot.slane %v984_v15, %v2609_v11  ;;  %v2693_v59 = vrot.slane %v984_v15, %v2614_v13 }
 0x1d2   :  { %v2013_v48 = vpop.eup %2012  ;;  %2024 = vtanh.f32 %v854_v46 }
 0x1d3   :  { %v2015_v49 = vpop.eup %2014 }
 0x1d4   :  { %v2017_v50 = vpop.eup %2016  ;;  %v948_v51 = vpack.c.bf16 %v2015_v49, %v2011_v47 }
 0x1d5   :  { %v949_v52 = vpack.c.bf16 %v2017_v50, %v2013_v48 }
 0x1d7   :  { %1328 = vmatprep.mubr.bf16.mxu1 %v949_v52 }
 0x1d8   :  { %1329 = vmatmul.mubr.bf16.gmra.mrb[44].mxu1 %v948_v51 }
 0x1d9   :  { %v2019_v53 = vpop.eup %2018 }
 0x1da   :  { %v2021_v54 = vpop.eup %2020 }
 0x1db   :  { %v2023_v55 = vpop.eup %2022 }
 0x1dc   :  { %v2025_v14 = vpop.eup %2024  ;;  %v950_v56 = vpack.c.bf16 %v2023_v55, %v2019_v53 }
 0x1dd   :  { %v951_v57 = vpack.c.bf16 %v2025_v14, %v2021_v54 }
 0x1df   :  { %1338 = vmatprep.mubr.bf16.mxu1 %v951_v57 }
 0x1e0   :  { %1339 = vmatmul.mubr.bf16.gmra.mrb[48].mxu1 %v950_v56 }
 0x23b   :  { %v1190_v60 = vpop.f32.mrb[64].mxu0 }
 0x23c   :  { %v1191_v61 = vadd.f32 %v1190_v60, %v2690_v58  ;;  %v1192_v62 = vpop.f32.mrb[65].mxu0 }
 0x23d   :  { %v1193_v63 = vadd.f32 %v1192_v62, %v2693_v59  ;;  %v1194_v0 = vpop.f32.mrb[66].mxu0 }
 0x23e   :  { %2026 = vtanh.f32 %v1191_v61  ;;  %v1195_v2 = vadd.f32 %v1194_v0, %v2690_v58  ;;  %v1196_v3 = vpop.f32.mrb[67].mxu0 }
 0x23f   :  { %2028 = vtanh.f32 %v1193_v63  ;;  %v1197_v4 = vadd.f32 %v1196_v3, %v2693_v59 }
 0x240   :  { %2030 = vtanh.f32 %v1195_v2 }
 0x241   :  { %2032 = vtanh.f32 %v1197_v4 }
 0x243   :  { %v1200_v6 = vpop.f32.mrb[68].mxu0 }
 0x244   :  { %v1201_v7 = vadd.f32 %v1200_v6, %v2690_v58  ;;  %v1202_v8 = vpop.f32.mrb[69].mxu0 }
 0x245   :  { %v1203_v9 = vadd.f32 %v1202_v8, %v2693_v59  ;;  %v1204_v10 = vpop.f32.mrb[70].mxu0 }
 0x246   :  { %2034 = vtanh.f32 %v1201_v7  ;;  %v1205_v1 = vadd.f32 %v1204_v10, %v2690_v58  ;;  %v1206_v16 = vpop.f32.mrb[71].mxu0 }
 0x247   :  { %2036 = vtanh.f32 %v1203_v9  ;;  %v1207_v18 = vadd.f32 %v1206_v16, %v2693_v59 }
 0x248   :  { %v2027_v19 = vpop.eup %2026  ;;  %2038 = vtanh.f32 %v1205_v1 }
 0x249   :  { %v2029_v20 = vpop.eup %2028  ;;  %2040 = vtanh.f32 %v1207_v18  ;;  %v1425_v21 = vmul.f32 %v2027_v19, %v2705_v12 }
 0x24a   :  { %v2031_v22 = vpop.eup %2030  ;;  %v1426_v11 = vmul.f32 %v2029_v20, %v2709_v17 }
 0x24b   :  { %v2033_v23 = vpop.eup %2032  ;;  %v1210_v24 = vpop.f32.mrb[72].mxu0  ;;  %v1427_v25 = vmul.f32 %v2031_v22, %v2705_v12 }
 0x24c   :  { %v1211_v26 = vadd.f32 %v1210_v24, %v2690_v58  ;;  %v1212_v13 = vpop.f32.mrb[73].mxu0  ;;  %v1489_v27 = vadd.f32 %v1426_v11, %v1425_v21  ;;  %v1428_v28 = vmul.f32 %v2033_v23, %v2709_v17 }
 0x24d   :  { %v1213_v29 = vadd.f32 %v1212_v13, %v2693_v59  ;;  %v1214_v30 = vpop.f32.mrb[74].mxu0 }
 0x24e   :  { %2042 = vtanh.f32 %v1211_v26  ;;  %v1215_v31 = vadd.f32 %v1214_v30, %v2690_v58  ;;  %v1216_v32 = vpop.f32.mrb[75].mxu0  ;;  %1490 = vadd.xlane.f32.xlu0 %v1489_v27  ;;  %v1492_v33 = vadd.f32 %v1428_v28, %v1427_v25 }
 0x24f   :  { %2044 = vtanh.f32 %v1213_v29  ;;  %v1217_v34 = vadd.f32 %v1216_v32, %v2693_v59 }
 0x250   :  { %v2035_v35 = vpop.eup %2034  ;;  %2046 = vtanh.f32 %v1215_v31  ;;  %1493 = vadd.xlane.f32.xlu1 %v1492_v33 }
 0x251   :  { %v2037_v36 = vpop.eup %2036  ;;  %2048 = vtanh.f32 %v1217_v34  ;;  %v1429_v37 = vmul.f32 %v2035_v35, %v2705_v12 }
 0x252   :  { %v2039_v38 = vpop.eup %2038  ;;  %v1430_v39 = vmul.f32 %v2037_v36, %v2709_v17 }
 0x253   :  { %v2041_v40 = vpop.eup %2040  ;;  %v1220_v41 = vpop.f32.mrb[0].mxu1  ;;  %v1431_v42 = vmul.f32 %v2039_v38, %v2705_v12 }
 0x254   :  { %v1221_v43 = vadd.f32 %v1220_v41, %v2690_v58  ;;  %v1222_v44 = vpop.f32.mrb[1].mxu1  ;;  %v1495_v45 = vadd.f32 %v1430_v39, %v1429_v37  ;;  %v1432_v46 = vmul.f32 %v2041_v40, %v2709_v17 }
 0x255   :  { %v1223_v47 = vadd.f32 %v1222_v44, %v2693_v59  ;;  %v1224_v48 = vpop.f32.mrb[2].mxu1 }
 0x256   :  { %2050 = vtanh.f32 %v1221_v43  ;;  %v1225_v49 = vadd.f32 %v1224_v48, %v2690_v58  ;;  %v1226_v50 = vpop.f32.mrb[3].mxu1  ;;  %1496 = vadd.xlane.f32.xlu0 %v1495_v45  ;;  %v1498_v51 = vadd.f32 %v1432_v46, %v1431_v42 }
 0x257   :  { %2052 = vtanh.f32 %v1223_v47  ;;  %v1227_v52 = vadd.f32 %v1226_v50, %v2693_v59 }
 0x258   :  { %v2043_v53 = vpop.eup %2042  ;;  %2054 = vtanh.f32 %v1225_v49 }
 0x259   :  { %v2045_v54 = vpop.eup %2044  ;;  %2056 = vtanh.f32 %v1227_v52  ;;  %v1433_v55 = vmul.f32 %v2043_v53, %v2705_v12 }
 0x25a   :  { %v2047_v14 = vpop.eup %2046  ;;  %1499 = vadd.xlane.f32.xlu0 %v1498_v51  ;;  %v1434_v56 = vmul.f32 %v2045_v54, %v2709_v17 }
 0x25b   :  { %v2049_v57 = vpop.eup %2048  ;;  %v1230_v15 = vpop.f32.mrb[4].mxu1  ;;  %v1435_v60 = vmul.f32 %v2047_v14, %v2705_v12 }
 0x25c   :  { %v1231_v61 = vadd.f32 %v1230_v15, %v2690_v58  ;;  %v1232_v62 = vpop.f32.mrb[5].mxu1  ;;  %v1501_v63 = vadd.f32 %v1434_v56, %v1433_v55  ;;  %v1436_v0 = vmul.f32 %v2049_v57, %v2709_v17 }
 0x25d   :  { %v1233_v2 = vadd.f32 %v1232_v62, %v2693_v59  ;;  %v1234_v3 = vpop.f32.mrb[6].mxu1 }
 0x25e   :  { %2058 = vtanh.f32 %v1231_v61  ;;  %v1235_v4 = vadd.f32 %v1234_v3, %v2690_v58  ;;  %v1236_v5 = vpop.f32.mrb[7].mxu1  ;;  %1502 = vadd.xlane.f32.xlu1 %v1501_v63  ;;  %v1504_v6 = vadd.f32 %v1436_v0, %v1435_v60 }
 0x25f   :  { %2060 = vtanh.f32 %v1233_v2  ;;  %v1237_v7 = vadd.f32 %v1236_v5, %v2693_v59 }
 0x260   :  { %v2051_v8 = vpop.eup %2050  ;;  %2062 = vtanh.f32 %v1235_v4  ;;  %1505 = vadd.xlane.f32.xlu0 %v1504_v6 }
 0x261   :  { %v2053_v9 = vpop.eup %2052  ;;  %2064 = vtanh.f32 %v1237_v7  ;;  %v1437_v10 = vmul.f32 %v2051_v8, %v2705_v12 }
 0x262   :  { %v2055_v1 = vpop.eup %2054  ;;  %v1438_v16 = vmul.f32 %v2053_v9, %v2709_v17 }
 0x263   :  { %v2057_v18 = vpop.eup %2056  ;;  %v1240_v19 = vpop.f32.mrb[8].mxu1  ;;  %v1439_v20 = vmul.f32 %v2055_v1, %v2705_v12 }
 0x264   :  { %v1241_v21 = vadd.f32 %v1240_v19, %v2690_v58  ;;  %v1242_v22 = vpop.f32.mrb[9].mxu1  ;;  %v1507_v11 = vadd.f32 %v1438_v16, %v1437_v10  ;;  %v1440_v23 = vmul.f32 %v2057_v18, %v2709_v17 }
 0x265   :  { %v1243_v24 = vadd.f32 %v1242_v22, %v2693_v59  ;;  %v1244_v25 = vpop.f32.mrb[10].mxu1 }
 0x266   :  { %2066 = vtanh.f32 %v1241_v21  ;;  %v1245_v26 = vadd.f32 %v1244_v25, %v2690_v58  ;;  %v1246_v13 = vpop.f32.mrb[11].mxu1  ;;  %1508 = vadd.xlane.f32.xlu1 %v1507_v11  ;;  %v1510_v27 = vadd.f32 %v1440_v23, %v1439_v20 }
 0x267   :  { %2068 = vtanh.f32 %v1243_v24  ;;  %v1247_v28 = vadd.f32 %v1246_v13, %v2693_v59 }
 0x268   :  { %v2059_v29 = vpop.eup %2058  ;;  %2070 = vtanh.f32 %v1245_v26  ;;  %1511 = vadd.xlane.f32.xlu0 %v1510_v27 }
 0x269   :  { %v2061_v30 = vpop.eup %2060  ;;  %2072 = vtanh.f32 %v1247_v28  ;;  %v1441_v31 = vmul.f32 %v2059_v29, %v2705_v12 }
 0x26a   :  { %v2063_v32 = vpop.eup %2062  ;;  %v1442_v33 = vmul.f32 %v2061_v30, %v2709_v17 }
 0x26b   :  { %v2065_v34 = vpop.eup %2064  ;;  %v1250_v35 = vpop.f32.mrb[12].mxu1  ;;  %v1443_v36 = vmul.f32 %v2063_v32, %v2705_v12 }
 0x26c   :  { %v1251_v37 = vadd.f32 %v1250_v35, %v2690_v58  ;;  %v1252_v38 = vpop.f32.mrb[13].mxu1  ;;  %v1513_v39 = vadd.f32 %v1442_v33, %v1441_v31  ;;  %v1444_v40 = vmul.f32 %v2065_v34, %v2709_v17 }
 0x26d   :  { %v1253_v41 = vadd.f32 %v1252_v38, %v2693_v59  ;;  %v1254_v42 = vpop.f32.mrb[14].mxu1 }
 0x26e   :  { %2074 = vtanh.f32 %v1251_v37  ;;  %v1255_v43 = vadd.f32 %v1254_v42, %v2690_v58  ;;  %v1256_v44 = vpop.f32.mrb[15].mxu1  ;;  %1514 = vadd.xlane.f32.xlu1 %v1513_v39  ;;  %v1516_v45 = vadd.f32 %v1444_v40, %v1443_v36 }
 0x26f   :  { %2076 = vtanh.f32 %v1253_v41  ;;  %v1257_v46 = vadd.f32 %v1256_v44, %v2693_v59 }
 0x270   :  { %v2067_v47 = vpop.eup %2066  ;;  %2078 = vtanh.f32 %v1255_v43  ;;  %1517 = vadd.xlane.f32.xlu0 %v1516_v45 }
 0x271   :  { %v2069_v48 = vpop.eup %2068  ;;  %2080 = vtanh.f32 %v1257_v46  ;;  %v1445_v49 = vmul.f32 %v2067_v47, %v2705_v12 }
 0x272   :  { %v2071_v50 = vpop.eup %2070  ;;  %v1446_v51 = vmul.f32 %v2069_v48, %v2709_v17 }
 0x273   :  { %v2073_v52 = vpop.eup %2072  ;;  %v1260_v53 = vpop.f32.mrb[16].mxu1  ;;  %v1447_v54 = vmul.f32 %v2071_v50, %v2705_v12 }
 0x274   :  { %v1261_v55 = vadd.f32 %v1260_v53, %v2690_v58  ;;  %v1262_v14 = vpop.f32.mrb[17].mxu1  ;;  %v1519_v56 = vadd.f32 %v1446_v51, %v1445_v49  ;;  %v1448_v57 = vmul.f32 %v2073_v52, %v2709_v17 }
 0x275   :  { %v1263_v15 = vadd.f32 %v1262_v14, %v2693_v59  ;;  %v1264_v60 = vpop.f32.mrb[18].mxu1 }
 0x276   :  { %2082 = vtanh.f32 %v1261_v55  ;;  %v1265_v61 = vadd.f32 %v1264_v60, %v2690_v58  ;;  %v1266_v62 = vpop.f32.mrb[19].mxu1  ;;  %1520 = vadd.xlane.f32.xlu1 %v1519_v56  ;;  %v1522_v63 = vadd.f32 %v1448_v57, %v1447_v54 }
 0x277   :  { %2084 = vtanh.f32 %v1263_v15  ;;  %v1267_v0 = vadd.f32 %v1266_v62, %v2693_v59 }
 0x278   :  { %v2075_v2 = vpop.eup %2074  ;;  %2086 = vtanh.f32 %v1265_v61  ;;  %1523 = vadd.xlane.f32.xlu0 %v1522_v63 }
 0x279   :  { %v2077_v3 = vpop.eup %2076  ;;  %2088 = vtanh.f32 %v1267_v0  ;;  %v1449_v4 = vmul.f32 %v2075_v2, %v2705_v12 }
 0x27a   :  { %v2079_v5 = vpop.eup %2078  ;;  %v1450_v6 = vmul.f32 %v2077_v3, %v2709_v17 }
 0x27b   :  { %v2081_v7 = vpop.eup %2080  ;;  %v1270_v8 = vpop.f32.mrb[20].mxu1  ;;  %v1451_v9 = vmul.f32 %v2079_v5, %v2705_v12 }
 0x27c   :  { %v1271_v10 = vadd.f32 %v1270_v8, %v2690_v58  ;;  %v1272_v1 = vpop.f32.mrb[21].mxu1  ;;  %v1525_v16 = vadd.f32 %v1450_v6, %v1449_v4  ;;  %v1452_v18 = vmul.f32 %v2081_v7, %v2709_v17 }
 0x27d   :  { %v1273_v19 = vadd.f32 %v1272_v1, %v2693_v59  ;;  %v1274_v20 = vpop.f32.mrb[22].mxu1 }
 0x27e   :  { %2090 = vtanh.f32 %v1271_v10  ;;  %v1275_v21 = vadd.f32 %v1274_v20, %v2690_v58  ;;  %v1276_v22 = vpop.f32.mrb[23].mxu1  ;;  %1526 = vadd.xlane.f32.xlu1 %v1525_v16  ;;  %v1528_v11 = vadd.f32 %v1452_v18, %v1451_v9 }
 0x27f   :  { %2092 = vtanh.f32 %v1273_v19  ;;  %v1277_v23 = vadd.f32 %v1276_v22, %v2693_v59 }
 0x280   :  { %v2083_v24 = vpop.eup %2082  ;;  %2094 = vtanh.f32 %v1275_v21  ;;  %1529 = vadd.xlane.f32.xlu0 %v1528_v11 }
 0x281   :  { %v2085_v25 = vpop.eup %2084  ;;  %2096 = vtanh.f32 %v1277_v23  ;;  %v1453_v26 = vmul.f32 %v2083_v24, %v2705_v12 }
 0x282   :  { %v2087_v13 = vpop.eup %2086  ;;  %v1454_v27 = vmul.f32 %v2085_v25, %v2709_v17 }
 0x283   :  { %v2089_v28 = vpop.eup %2088  ;;  %v1280_v29 = vpop.f32.mrb[24].mxu1  ;;  %v1455_v30 = vmul.f32 %v2087_v13, %v2705_v12 }
 0x284   :  { %v1281_v31 = vadd.f32 %v1280_v29, %v2690_v58  ;;  %v1282_v32 = vpop.f32.mrb[25].mxu1  ;;  %v1531_v33 = vadd.f32 %v1454_v27, %v1453_v26  ;;  %v1456_v34 = vmul.f32 %v2089_v28, %v2709_v17 }
 0x285   :  { %v1283_v35 = vadd.f32 %v1282_v32, %v2693_v59  ;;  %v1284_v36 = vpop.f32.mrb[26].mxu1 }
 0x286   :  { %2098 = vtanh.f32 %v1281_v31  ;;  %v1285_v37 = vadd.f32 %v1284_v36, %v2690_v58  ;;  %v1286_v38 = vpop.f32.mrb[27].mxu1  ;;  %1532 = vadd.xlane.f32.xlu1 %v1531_v33  ;;  %v1534_v39 = vadd.f32 %v1456_v34, %v1455_v30 }
 0x287   :  { %2100 = vtanh.f32 %v1283_v35  ;;  %v1287_v40 = vadd.f32 %v1286_v38, %v2693_v59 }
 0x288   :  { %v2091_v41 = vpop.eup %2090  ;;  %2102 = vtanh.f32 %v1285_v37  ;;  %1535 = vadd.xlane.f32.xlu0 %v1534_v39 }
 0x289   :  { %v2093_v42 = vpop.eup %2092  ;;  %2104 = vtanh.f32 %v1287_v40  ;;  %v1457_v43 = vmul.f32 %v2091_v41, %v2705_v12 }
 0x28a   :  { %v2095_v44 = vpop.eup %2094  ;;  %v1458_v45 = vmul.f32 %v2093_v42, %v2709_v17 }
 0x28b   :  { %v2097_v46 = vpop.eup %2096  ;;  %v1290_v47 = vpop.f32.mrb[28].mxu1  ;;  %v1459_v48 = vmul.f32 %v2095_v44, %v2705_v12 }
 0x28c   :  { %v1291_v49 = vadd.f32 %v1290_v47, %v2690_v58  ;;  %v1292_v50 = vpop.f32.mrb[29].mxu1  ;;  %v1537_v51 = vadd.f32 %v1458_v45, %v1457_v43  ;;  %v1460_v52 = vmul.f32 %v2097_v46, %v2709_v17 }
 0x28d   :  { %v1293_v53 = vadd.f32 %v1292_v50, %v2693_v59  ;;  %v1294_v54 = vpop.f32.mrb[30].mxu1 }
 0x28e   :  { %2106 = vtanh.f32 %v1291_v49  ;;  %v1295_v55 = vadd.f32 %v1294_v54, %v2690_v58  ;;  %v1296_v14 = vpop.f32.mrb[31].mxu1  ;;  %1538 = vadd.xlane.f32.xlu1 %v1537_v51  ;;  %v1540_v56 = vadd.f32 %v1460_v52, %v1459_v48 }
 0x28f   :  { %2108 = vtanh.f32 %v1293_v53  ;;  %v1297_v57 = vadd.f32 %v1296_v14, %v2693_v59 }
 0x290   :  { %v2099_v15 = vpop.eup %2098  ;;  %2110 = vtanh.f32 %v1295_v55  ;;  %1541 = vadd.xlane.f32.xlu0 %v1540_v56 }
 0x291   :  { %v2101_v60 = vpop.eup %2100  ;;  %2112 = vtanh.f32 %v1297_v57  ;;  %v1461_v61 = vmul.f32 %v2099_v15, %v2705_v12 }
 0x292   :  { %v2103_v62 = vpop.eup %2102  ;;  %v1462_v63 = vmul.f32 %v2101_v60, %v2709_v17 }
 0x293   :  { %v2105_v0 = vpop.eup %2104  ;;  %v1300_v2 = vpop.f32.mrb[32].mxu1  ;;  %v1463_v3 = vmul.f32 %v2103_v62, %v2705_v12 }
 0x294   :  { %v1301_v4 = vadd.f32 %v1300_v2, %v2690_v58  ;;  %v1302_v5 = vpop.f32.mrb[33].mxu1  ;;  %v1543_v6 = vadd.f32 %v1462_v63, %v1461_v61  ;;  %v1464_v7 = vmul.f32 %v2105_v0, %v2709_v17 }
 0x295   :  { %v1303_v8 = vadd.f32 %v1302_v5, %v2693_v59  ;;  %v1304_v9 = vpop.f32.mrb[34].mxu1 }
 0x296   :  { %2114 = vtanh.f32 %v1301_v4  ;;  %v1305_v10 = vadd.f32 %v1304_v9, %v2690_v58  ;;  %v1306_v1 = vpop.f32.mrb[35].mxu1  ;;  %1544 = vadd.xlane.f32.xlu1 %v1543_v6  ;;  %v1546_v16 = vadd.f32 %v1464_v7, %v1463_v3 }
 0x297   :  { %2116 = vtanh.f32 %v1303_v8  ;;  %v1307_v18 = vadd.f32 %v1306_v1, %v2693_v59 }
 0x298   :  { %v2107_v19 = vpop.eup %2106  ;;  %2118 = vtanh.f32 %v1305_v10  ;;  %1547 = vadd.xlane.f32.xlu0 %v1546_v16 }
 0x299   :  { %v2109_v20 = vpop.eup %2108  ;;  %2120 = vtanh.f32 %v1307_v18  ;;  %v1465_v21 = vmul.f32 %v2107_v19, %v2705_v12 }
 0x29a   :  { %v2111_v22 = vpop.eup %2110  ;;  %v1466_v11 = vmul.f32 %v2109_v20, %v2709_v17 }
 0x29b   :  { %v2113_v23 = vpop.eup %2112  ;;  %v1310_v24 = vpop.f32.mrb[36].mxu1  ;;  %v1467_v25 = vmul.f32 %v2111_v22, %v2705_v12 }
 0x29c   :  { %v1311_v26 = vadd.f32 %v1310_v24, %v2690_v58  ;;  %v1312_v13 = vpop.f32.mrb[37].mxu1  ;;  %v1549_v27 = vadd.f32 %v1466_v11, %v1465_v21  ;;  %v1468_v28 = vmul.f32 %v2113_v23, %v2709_v17 }
 0x29d   :  { %v1313_v29 = vadd.f32 %v1312_v13, %v2693_v59  ;;  %v1314_v30 = vpop.f32.mrb[38].mxu1 }
 0x29e   :  { %2122 = vtanh.f32 %v1311_v26  ;;  %v1315_v31 = vadd.f32 %v1314_v30, %v2690_v58  ;;  %v1316_v32 = vpop.f32.mrb[39].mxu1  ;;  %1550 = vadd.xlane.f32.xlu1 %v1549_v27  ;;  %v1552_v33 = vadd.f32 %v1468_v28, %v1467_v25 }
 0x29f   :  { %2124 = vtanh.f32 %v1313_v29  ;;  %v1317_v34 = vadd.f32 %v1316_v32, %v2693_v59 }
 0x2a0   :  { %v2115_v35 = vpop.eup %2114  ;;  %2126 = vtanh.f32 %v1315_v31  ;;  %1553 = vadd.xlane.f32.xlu0 %v1552_v33 }
 0x2a1   :  { %v2117_v36 = vpop.eup %2116  ;;  %2128 = vtanh.f32 %v1317_v34  ;;  %v1469_v37 = vmul.f32 %v2115_v35, %v2705_v12 }
 0x2a2   :  { %v2119_v38 = vpop.eup %2118  ;;  %v1470_v39 = vmul.f32 %v2117_v36, %v2709_v17 }
 0x2a3   :  { %v2121_v40 = vpop.eup %2120  ;;  %v1320_v41 = vpop.f32.mrb[40].mxu1  ;;  %v1471_v42 = vmul.f32 %v2119_v38, %v2705_v12 }
 0x2a4   :  { %v1321_v43 = vadd.f32 %v1320_v41, %v2690_v58  ;;  %v1322_v44 = vpop.f32.mrb[41].mxu1  ;;  %v1555_v45 = vadd.f32 %v1470_v39, %v1469_v37  ;;  %v1472_v46 = vmul.f32 %v2121_v40, %v2709_v17 }
 0x2a5   :  { %v1323_v47 = vadd.f32 %v1322_v44, %v2693_v59  ;;  %v1324_v48 = vpop.f32.mrb[42].mxu1 }
 0x2a6   :  { %2130 = vtanh.f32 %v1321_v43  ;;  %v1325_v49 = vadd.f32 %v1324_v48, %v2690_v58  ;;  %v1326_v50 = vpop.f32.mrb[43].mxu1  ;;  %1556 = vadd.xlane.f32.xlu1 %v1555_v45  ;;  %v1558_v51 = vadd.f32 %v1472_v46, %v1471_v42 }
 0x2a7   :  { %2132 = vtanh.f32 %v1323_v47  ;;  %v1327_v52 = vadd.f32 %v1326_v50, %v2693_v59  ;;  %v2835_v47 = vstv %s3005_s8 }
 0x2a8   :  { %v2123_v53 = vpop.eup %2122  ;;  %2134 = vtanh.f32 %v1325_v49  ;;  %1559 = vadd.xlane.f32.xlu0 %v1558_v51 }
 0x2a9   :  { %v2125_v54 = vpop.eup %2124  ;;  %2136 = vtanh.f32 %v1327_v52  ;;  %v1473_v55 = vmul.f32 %v2123_v53, %v2705_v12 }
 0x2aa   :  { %v2127_v14 = vpop.eup %2126  ;;  %v1474_v56 = vmul.f32 %v2125_v54, %v2709_v17 }
 0x2ab   :  { %v2129_v57 = vpop.eup %2128  ;;  %v1330_v15 = vpop.f32.mrb[44].mxu1  ;;  %v1475_v60 = vmul.f32 %v2127_v14, %v2705_v12 }
 0x2ac   :  { %v1331_v61 = vadd.f32 %v1330_v15, %v2690_v58  ;;  %v1332_v62 = vpop.f32.mrb[45].mxu1  ;;  %v1561_v63 = vadd.f32 %v1474_v56, %v1473_v55  ;;  %v1476_v0 = vmul.f32 %v2129_v57, %v2709_v17 }
 0x2ad   :  { %v1333_v2 = vadd.f32 %v1332_v62, %v2693_v59  ;;  %v1334_v3 = vpop.f32.mrb[46].mxu1 }
 0x2ae   :  { %2138 = vtanh.f32 %v1331_v61  ;;  %v1335_v4 = vadd.f32 %v1334_v3, %v2690_v58  ;;  %v1336_v5 = vpop.f32.mrb[47].mxu1  ;;  %1562 = vadd.xlane.f32.xlu1 %v1561_v63  ;;  %v1564_v6 = vadd.f32 %v1476_v0, %v1475_v60 }
 0x2af   :  { %2140 = vtanh.f32 %v1333_v2  ;;  %v1337_v7 = vadd.f32 %v1336_v5, %v2693_v59 }
 0x2b0   :  { %v2131_v8 = vpop.eup %2130  ;;  %2142 = vtanh.f32 %v1335_v4  ;;  %1565 = vadd.xlane.f32.xlu0 %v1564_v6 }
 0x2b1   :  { %v2133_v9 = vpop.eup %2132  ;;  %2144 = vtanh.f32 %v1337_v7  ;;  %v1477_v10 = vmul.f32 %v2131_v8, %v2705_v12 }
 0x2b2   :  { %v2135_v1 = vpop.eup %2134  ;;  %v1478_v16 = vmul.f32 %v2133_v9, %v2709_v17 }
 0x2b3   :  { %v2137_v18 = vpop.eup %2136  ;;  %v1340_v19 = vpop.f32.mrb[48].mxu1  ;;  %v1479_v20 = vmul.f32 %v2135_v1, %v2705_v12 }
 0x2b4   :  { %v1341_v21 = vadd.f32 %v1340_v19, %v2690_v58  ;;  %v1342_v22 = vpop.f32.mrb[49].mxu1  ;;  %v1567_v11 = vadd.f32 %v1478_v16, %v1477_v10  ;;  %v1480_v23 = vmul.f32 %v2137_v18, %v2709_v17 }
 0x2b5   :  { %v1343_v24 = vadd.f32 %v1342_v22, %v2693_v59  ;;  %v1344_v25 = vpop.f32.mrb[50].mxu1 }
 0x2b6   :  { %2146 = vtanh.f32 %v1341_v21  ;;  %v1345_v26 = vadd.f32 %v1344_v25, %v2690_v58  ;;  %v1346_v13 = vpop.f32.mrb[51].mxu1  ;;  %1568 = vadd.xlane.f32.xlu1 %v1567_v11  ;;  %v1570_v27 = vadd.f32 %v1480_v23, %v1479_v20 }
 0x2b7   :  { %2148 = vtanh.f32 %v1343_v24  ;;  %v1347_v28 = vadd.f32 %v1346_v13, %v2693_v59 }
 0x2b8   :  { %v2139_v29 = vpop.eup %2138  ;;  %2150 = vtanh.f32 %v1345_v26  ;;  %1571 = vadd.xlane.f32.xlu0 %v1570_v27 }
 0x2b9   :  { %v2141_v30 = vpop.eup %2140  ;;  %2152 = vtanh.f32 %v1347_v28  ;;  %v1481_v31 = vmul.f32 %v2139_v29, %v2705_v12 }
 0x2ba   :  { %v2143_v32 = vpop.eup %2142  ;;  %v1482_v33 = vmul.f32 %v2141_v30, %v2709_v17 }
 0x2bb   :  { %v2145_v34 = vpop.eup %2144  ;;  %v1483_v35 = vmul.f32 %v2143_v32, %v2705_v12 }
 0x2bc   :  { %v1573_v58 = vadd.f32 %v1482_v33, %v1481_v31  ;;  %v1484_v36 = vmul.f32 %v2145_v34, %v2709_v17 }
 0x2be   :  { %1574 = vadd.xlane.f32.xlu1 %v1573_v58  ;;  %v1576_v37 = vadd.f32 %v1484_v36, %v1483_v35 }
 0x2c0   :  { %v2147_v38 = vpop.eup %2146  ;;  %1577 = vadd.xlane.f32.xlu0 %v1576_v37 }
 0x2c1   :  { %v2149_v59 = vpop.eup %2148  ;;  %v1485_v39 = vmul.f32 %v2147_v38, %v2705_v12 }
 0x2c2   :  { %v2151_v40 = vpop.eup %2150  ;;  %v1486_v41 = vmul.f32 %v2149_v59, %v2709_v17 }
 0x2c3   :  { %v2153_v42 = vpop.eup %2152  ;;  %v1487_v43 = vmul.f32 %v2151_v40, %v2705_v12 }
 0x2c4   :  { %v1579_v44 = vadd.f32 %v1486_v41, %v1485_v39  ;;  %v1488_v45 = vmul.f32 %v2153_v42, %v2709_v17 }
 0x2c6   :  { %1580 = vadd.xlane.f32.xlu1 %v1579_v44  ;;  %v1582_v46 = vadd.f32 %v1488_v45, %v1487_v43 }
 0x2c8   :  { %1583 = vadd.xlane.f32.xlu0 %v1582_v46 }
 0x2db   :  { %v1491_v48 = vpop.xlane.xlu0 %1490 }
 0x2dc   :  { %v1587_v49 = vadd.f32 %v2835_v47, %v1491_v48 }
 0x2dd   :  { %v1494_v50 = vpop.xlane.xlu1 %1493 }
 0x2de   :  { %1620 = vst.msk [vmem:[%s3006_s9] sm:$0xff] %vm1619_vm5, %v1587_v49  ;;  %v1588_v12 = vadd.f32 %v2835_v47, %v1494_v50 }
 0x2e0   :  { %1621 = vst.msk [vmem:[%s3006_s9 + $0x8] sm:$0xff] %vm1619_vm5, %v1588_v12 }
 0x2e3   :  { %v1497_v17 = vpop.xlane.xlu0 %1496 }
 0x2e4   :  { %v1589_v51 = vadd.f32 %v2835_v47, %v1497_v17 }
 0x2e6   :  { %1622 = vst.msk [vmem:[%s3006_s9 + $0x10] sm:$0xff] %vm1619_vm5, %v1589_v51 }
 0x2e7   :  { %v1500_v52 = vpop.xlane.xlu0 %1499 }
 0x2e8   :  { %v1590_v53 = vadd.f32 %v2835_v47, %v1500_v52 }
 0x2ea   :  { %1623 = vst.msk [vmem:[%s3006_s9 + $0x18] sm:$0xff] %vm1619_vm5, %v1590_v53 }
 0x2eb   :  { %v1503_v54 = vpop.xlane.xlu1 %1502 }
 0x2ec   :  { %v1591_v55 = vadd.f32 %v2835_v47, %v1503_v54 }
 0x2ed   :  { %v1506_v14 = vpop.xlane.xlu0 %1505 }
 0x2ee   :  { %1624 = vst.msk [vmem:[%s3006_s9 + $0x20] sm:$0xff] %vm1619_vm5, %v1591_v55  ;;  %v1592_v56 = vadd.f32 %v2835_v47, %v1506_v14 }
 0x2f0   :  { %1625 = vst.msk [vmem:[%s3006_s9 + $0x28] sm:$0xff] %vm1619_vm5, %v1592_v56 }
 0x2f3   :  { %v1509_v57 = vpop.xlane.xlu1 %1508 }
 0x2f4   :  { %v1593_v15 = vadd.f32 %v2835_v47, %v1509_v57 }
 0x2f5   :  { %v1512_v60 = vpop.xlane.xlu0 %1511 }
 0x2f6   :  { %1626 = vst.msk [vmem:[%s3006_s9 + $0x30] sm:$0xff] %vm1619_vm5, %v1593_v15  ;;  %v1594_v61 = vadd.f32 %v2835_v47, %v1512_v60 }
 0x2f8   :  { %1627 = vst.msk [vmem:[%s3006_s9 + $0x38] sm:$0xff] %vm1619_vm5, %v1594_v61 }
 0x2fb   :  { %v1515_v62 = vpop.xlane.xlu1 %1514 }
 0x2fc   :  { %v1595_v63 = vadd.f32 %v2835_v47, %v1515_v62 }
 0x2fd   :  { %v1518_v0 = vpop.xlane.xlu0 %1517 }
 0x2fe   :  { %1628 = vst.msk [vmem:[%s3006_s9 + $0x40] sm:$0xff] %vm1619_vm5, %v1595_v63  ;;  %v1596_v2 = vadd.f32 %v2835_v47, %v1518_v0 }
 0x300   :  { %1629 = vst.msk [vmem:[%s3006_s9 + $0x48] sm:$0xff] %vm1619_vm5, %v1596_v2 }
 0x303   :  { %v1521_v3 = vpop.xlane.xlu1 %1520 }
 0x304   :  { %v1597_v4 = vadd.f32 %v2835_v47, %v1521_v3 }
 0x305   :  { %v1524_v5 = vpop.xlane.xlu0 %1523 }
 0x306   :  { %1630 = vst.msk [vmem:[%s3006_s9 + $0x50] sm:$0xff] %vm1619_vm5, %v1597_v4  ;;  %v1598_v6 = vadd.f32 %v2835_v47, %v1524_v5 }
 0x308   :  { %1631 = vst.msk [vmem:[%s3006_s9 + $0x58] sm:$0xff] %vm1619_vm5, %v1598_v6 }
 0x30b   :  { %v1527_v7 = vpop.xlane.xlu1 %1526 }
 0x30c   :  { %v1599_v8 = vadd.f32 %v2835_v47, %v1527_v7 }
 0x30d   :  { %v1530_v9 = vpop.xlane.xlu0 %1529 }
 0x30e   :  { %1632 = vst.msk [vmem:[%s3006_s9 + $0x60] sm:$0xff] %vm1619_vm5, %v1599_v8  ;;  %v1600_v10 = vadd.f32 %v2835_v47, %v1530_v9 }
 0x310   :  { %1633 = vst.msk [vmem:[%s3006_s9 + $0x68] sm:$0xff] %vm1619_vm5, %v1600_v10 }
 0x313   :  { %v1533_v1 = vpop.xlane.xlu1 %1532 }
 0x314   :  { %v1601_v16 = vadd.f32 %v2835_v47, %v1533_v1 }
 0x315   :  { %v1536_v18 = vpop.xlane.xlu0 %1535 }
 0x316   :  { %1634 = vst.msk [vmem:[%s3006_s9 + $0x70] sm:$0xff] %vm1619_vm5, %v1601_v16  ;;  %v1602_v19 = vadd.f32 %v2835_v47, %v1536_v18 }
 0x318   :  { %1635 = vst.msk [vmem:[%s3006_s9 + $0x78] sm:$0xff] %vm1619_vm5, %v1602_v19 }
 0x31b   :  { %v1539_v20 = vpop.xlane.xlu1 %1538 }
 0x31c   :  { %v1603_v21 = vadd.f32 %v2835_v47, %v1539_v20 }
 0x31d   :  { %v1542_v22 = vpop.xlane.xlu0 %1541 }
 0x31e   :  { %1636 = vst.msk [vmem:[%s3006_s9 + $0x80] sm:$0xff] %vm1619_vm5, %v1603_v21  ;;  %v1604_v11 = vadd.f32 %v2835_v47, %v1542_v22 }
 0x320   :  { %1637 = vst.msk [vmem:[%s3006_s9 + $0x88] sm:$0xff] %vm1619_vm5, %v1604_v11 }
 0x323   :  { %v1545_v23 = vpop.xlane.xlu1 %1544 }
 0x324   :  { %v1605_v24 = vadd.f32 %v2835_v47, %v1545_v23 }
 0x325   :  { %v1548_v25 = vpop.xlane.xlu0 %1547 }
 0x326   :  { %1638 = vst.msk [vmem:[%s3006_s9 + $0x90] sm:$0xff] %vm1619_vm5, %v1605_v24  ;;  %v1606_v26 = vadd.f32 %v2835_v47, %v1548_v25 }
 0x328   :  { %1639 = vst.msk [vmem:[%s3006_s9 + $0x98] sm:$0xff] %vm1619_vm5, %v1606_v26 }
 0x32b   :  { %v1551_v13 = vpop.xlane.xlu1 %1550 }
 0x32c   :  { %v1607_v27 = vadd.f32 %v2835_v47, %v1551_v13 }
 0x32d   :  { %v1554_v28 = vpop.xlane.xlu0 %1553 }
 0x32e   :  { %1640 = vst.msk [vmem:[%s3006_s9 + $0xa0] sm:$0xff] %vm1619_vm5, %v1607_v27  ;;  %v1608_v29 = vadd.f32 %v2835_v47, %v1554_v28 }
 0x330   :  { %1641 = vst.msk [vmem:[%s3006_s9 + $0xa8] sm:$0xff] %vm1619_vm5, %v1608_v29 }
 0x333   :  { %v1557_v30 = vpop.xlane.xlu1 %1556 }
 0x334   :  { %v1609_v31 = vadd.f32 %v2835_v47, %v1557_v30 }
 0x335   :  { %v1560_v32 = vpop.xlane.xlu0 %1559 }
 0x336   :  { %1642 = vst.msk [vmem:[%s3006_s9 + $0xb0] sm:$0xff] %vm1619_vm5, %v1609_v31  ;;  %v1610_v33 = vadd.f32 %v2835_v47, %v1560_v32 }
 0x338   :  { %1643 = vst.msk [vmem:[%s3006_s9 + $0xb8] sm:$0xff] %vm1619_vm5, %v1610_v33 }
 0x33b   :  { %v1563_v34 = vpop.xlane.xlu1 %1562 }
 0x33c   :  { %v1611_v35 = vadd.f32 %v2835_v47, %v1563_v34 }
 0x33d   :  { %v1566_v58 = vpop.xlane.xlu0 %1565 }
 0x33e   :  { %1644 = vst.msk [vmem:[%s3006_s9 + $0xc0] sm:$0xff] %vm1619_vm5, %v1611_v35  ;;  %v1612_v36 = vadd.f32 %v2835_v47, %v1566_v58 }
 0x340   :  { %1645 = vst.msk [vmem:[%s3006_s9 + $0xc8] sm:$0xff] %vm1619_vm5, %v1612_v36 }
 0x343   :  { %v1569_v37 = vpop.xlane.xlu1 %1568 }
 0x344   :  { %v1613_v38 = vadd.f32 %v2835_v47, %v1569_v37 }
 0x345   :  { %v1572_v59 = vpop.xlane.xlu0 %1571 }
 0x346   :  { %1646 = vst.msk [vmem:[%s3006_s9 + $0xd0] sm:$0xff] %vm1619_vm5, %v1613_v38  ;;  %v1614_v39 = vadd.f32 %v2835_v47, %v1572_v59 }
 0x348   :  { %1647 = vst.msk [vmem:[%s3006_s9 + $0xd8] sm:$0xff] %vm1619_vm5, %v1614_v39 }
 0x34b   :  { %v1575_v40 = vpop.xlane.xlu1 %1574 }
 0x34c   :  { %v1615_v41 = vadd.f32 %v2835_v47, %v1575_v40 }
 0x34d   :  { %v1578_v42 = vpop.xlane.xlu0 %1577 }
 0x34e   :  { %1648 = vst.msk [vmem:[%s3006_s9 + $0xe0] sm:$0xff] %vm1619_vm5, %v1615_v41  ;;  %v1616_v43 = vadd.f32 %v2835_v47, %v1578_v42 }
 0x350   :  { %1649 = vst.msk [vmem:[%s3006_s9 + $0xe8] sm:$0xff] %vm1619_vm5, %v1616_v43 }
 0x353   :  { %v1581_v44 = vpop.xlane.xlu1 %1580 }
 0x354   :  { %v1617_v45 = vadd.f32 %v2835_v47, %v1581_v44 }
 0x355   :  { %v1584_v46 = vpop.xlane.xlu0 %1583 }
 0x356   :  { %1650 = vst.msk [vmem:[%s3006_s9 + $0xf0] sm:$0xff] %vm1619_vm5, %v1617_v45  ;;  %v1618_v48 = vadd.f32 %v2835_v47, %v1584_v46 }
 0x358   :  { %1651 = vst.msk [vmem:[%s3006_s9 + $0xf8] sm:$0xff] %vm1619_vm5, %v1618_v48 }

</bundles_post_ra>
